<compile_context>
chip_gen: v6e
topology: v6e:2x2x1
jax: 0.10.0
libtpu: 0.0.40
codegen_flags: <defaults>
</compile_context>

<pallas_src>
import numpy as np
import jax
import jax.numpy as jnp
from jax import lax
from jax.experimental import pallas as pl
from jax.experimental.pallas import tpu as pltpu

_LN_EPS = 1e-5


def _round_up(n: int, m: int) -> int:
    return ((n + m - 1) // m) * m


def _vmem_capacity_bytes() -> int:
    try:
        cap = getattr(pltpu.get_tpu_info(), "vmem_capacity_bytes", None)
        if cap:
            return int(cap)
    except Exception:
        pass
    return 64 * 1024 * 1024  # conservative default (v7x has the smallest VMEM)


# ---------------------------------------------------------------------------
# DurationPredictor: single fused kernel (conv1 + conv2 + linear head + exp)
# ---------------------------------------------------------------------------
def _ln_channels(h, g, beta):
    """LayerNorm over the channel axis (axis 0) of a [C, L] tile."""
    mu = jnp.mean(h, axis=0, keepdims=True)
    var = jnp.mean(jnp.square(h - mu), axis=0, keepdims=True)
    return (h - mu) * lax.rsqrt(var + _LN_EPS) * g + beta


def _dp_fused_kernel(xc_ref, w1_ref, b1_ref, g1_ref, be1_ref,
                     w2_ref, b2_ref, g2_ref, be2_ref, w3_ref, b3_ref, o_ref):
    # xc_ref : [1, K*Cin, L]  im2col'd input (time on lanes)
    # w1_ref : [Hid, K*Cin]   folded conv1 weight
    # w2_ref : [K, Out, Hid]  conv2 weight (per-tap, transposed)
    # w3_ref : [1, Out]  b3_ref : [1, 1]
    # o_ref  : [1, 1, L]      exp()'d durations, lane-dense
    L = o_ref.shape[2]
    K = w2_ref.shape[0]
    P = K // 2

    # ---- Conv1 (single im2col MXU matmul) + bias + ReLU + LayerNorm ----
    h1 = jnp.dot(w1_ref[...], xc_ref[0], preferred_element_type=jnp.float32)
    h1 = _ln_channels(jnp.maximum(h1 + b1_ref[...], 0.0), g1_ref[...], be1_ref[...])

    # ---- Conv2 ('same' zero pad built in-register) + bias + ReLU + LayerNorm ----
    if P > 0:
        zpad = jnp.zeros((h1.shape[0], P), jnp.float32)
        hp = jnp.concatenate([zpad, h1, zpad], axis=1)       # [Hid, L + 2P]
    else:
        hp = h1
    acc = jnp.zeros((w2_ref.shape[1], L), jnp.float32)
    for k in range(K):  # K is small & static -> unrolled; one MXU matmul per tap
        acc = acc + jnp.dot(w2_ref[k], hp[:, k:k + L],
                            preferred_element_type=jnp.float32)
    h2 = _ln_channels(jnp.maximum(acc + b2_ref[...], 0.0), g2_ref[...], be2_ref[...])

    # ---- Linear(dp_output_size, 1) + exp() -> lane-dense [1, L] ----
    pred = jnp.dot(w3_ref[...], h2, preferred_element_type=jnp.float32) + b3_ref[...]
    o_ref[0] = jnp.exp(pred)


def duration_predictor(x, params):
    """x: [B, L, Cin] -> float durations [B, L] (already exp()'d)."""
    B, L, cin = x.shape
    K, _, hid = params["w1"].shape
    out_ch = params["w2"].shape[2]
    P = K // 2

    # Time-on-lanes layout + im2col for conv1 (wrapper-side, one-time XLA ops).
    xT = jnp.transpose(x, (0, 2, 1))                       # [B, Cin, L]
    xpadT = jnp.pad(xT, ((0, 0), (0, 0), (P, P)))          # [B, Cin, L+2P]
    xcT = jnp.concatenate([xpadT[:, :, k:k + L] for k in range(K)], axis=1)

    w1ft = jnp.transpose(params["w1"].reshape(K * cin, hid))   # [Hid, K*Cin]
    w2t = jnp.transpose(params["w2"], (0, 2, 1))               # [K, Out, Hid]
    b1c = params["b1"].reshape(hid, 1)
    g1c = params["g1"].reshape(hid, 1)
    be1c = params["beta1"].reshape(hid, 1)
    b2c = params["b2"].reshape(out_ch, 1)
    g2c = params["g2"].reshape(out_ch, 1)
    be2c = params["beta2"].reshape(out_ch, 1)

    dur = pl.pallas_call(
        _dp_fused_kernel,
        out_shape=jax.ShapeDtypeStruct((B, 1, L), jnp.float32),
        grid_spec=pltpu.PrefetchScalarGridSpec(
            num_scalar_prefetch=0,
            grid=(B,),
            in_specs=[
                pl.BlockSpec((1, K * cin, L), lambda b: (b, 0, 0)),
                pl.BlockSpec((hid, K * cin), lambda b: (0, 0)),
                pl.BlockSpec((hid, 1), lambda b: (0, 0)),
                pl.BlockSpec((hid, 1), lambda b: (0, 0)),
                pl.BlockSpec((hid, 1), lambda b: (0, 0)),
                pl.BlockSpec((K, out_ch, hid), lambda b: (0, 0, 0)),
                pl.BlockSpec((out_ch, 1), lambda b: (0, 0)),
                pl.BlockSpec((out_ch, 1), lambda b: (0, 0)),
                pl.BlockSpec((out_ch, 1), lambda b: (0, 0)),
                pl.BlockSpec(params["w3"].shape, lambda b: (0, 0)),
                pl.BlockSpec(params["b3"].shape, lambda b: (0, 0)),
            ],
            out_specs=pl.BlockSpec((1, 1, L), lambda b: (b, 0, 0)),
        ),
        compiler_params=pltpu.CompilerParams(dimension_semantics=("parallel",)),
    )(xcT, w1ft, b1c, g1c, be1c, w2t, b2c, g2c, be2c, params["w3"], params["b3"])
    return dur[:, 0, :]   # [B, L]


# ---------------------------------------------------------------------------
# LR_function kernel (duration-driven expansion)
# ---------------------------------------------------------------------------
def _lr_expand_kernel(total_ref, cums_ref, x_ref, o_ref):
    # total_ref : SMEM [B] int32 (scalar prefetch) -- rounded total frames per batch
    # cums_ref  : VMEM [1, 2, L] int32 -- row 0 exclusive cumsum, row 1 inclusive
    # x_ref     : [1, L, D]    o_ref : [1, frame_tile, D]
    b = pl.program_id(0)
    f = pl.program_id(1)
    ft = o_ref.shape[1]
    start = f * ft

    @pl.when(start < total_ref[b])
    def _compute():
        cums = cums_ref[0]                                   # [2, L]
        ce = cums[0:1, :]                                    # [1, L]
        ci = cums[1:2, :]                                    # [1, L]
        t = start + lax.broadcasted_iota(jnp.int32, (ft, 1), 0)   # [ft, 1]
        mask = (t >= ce) & (t < ci)                          # [ft, L] interval one-hot
        # One-hot expansion on the MXU; exact in bf16 when x is bf16.
        o_ref[0] = jnp.dot(mask.astype(x_ref.dtype), x_ref[0],
                           preferred_element_type=jnp.float32).astype(o_ref.dtype)

    @pl.when(start >= total_ref[b])
    def _all_padding():
        o_ref[...] = jnp.zeros_like(o_ref)


def length_regulate(x, durations, max_frames=None, frame_tile=None):
    """Expand x [B, L, D] by float `durations` [B, L]; returns [B, max_frames, D]."""
    B, L, D = x.shape
    itemsize = jnp.dtype(x.dtype).itemsize

    dur_i = jnp.round(durations).astype(jnp.int32)          # valid=True branch of LR_function
    cum_incl = jnp.cumsum(dur_i, axis=-1)                    # [B, L]
    cum_excl = cum_incl - dur_i
    cums = jnp.stack([cum_excl, cum_incl], axis=1)           # [B, 2, L] merged input
    total = cum_incl[:, -1].astype(jnp.int32)                # [B]

    if max_frames is None:
        # torch: max_len = int(max(sum(float durations))) -- needs concrete values here.
        max_frames = max(int(jnp.max(jnp.sum(durations, axis=-1))), 1)

    vmem_cap = _vmem_capacity_bytes()

    if frame_tile is None:
        # Big lane-dense tiles: 4 MiB output-block budget on 128 MiB-VMEM chips
        # (v5e/v6e), 2 MiB on v7x; account for the [ft, L] mask intermediates.
        block_budget = (4 << 20) if vmem_cap >= (128 << 20) else (2 << 20)
        row_cost = D * itemsize + 2 * _round_up(L, 128) * 4
        frame_tile = max(8, min(2048, block_budget // max(row_cost, 1)) // 8 * 8)
        if B == 1 and max_frames > 16:
            # keep >= 2 frame tiles so both v7x TensorCores get work
            frame_tile = min(frame_tile, max(8, _round_up(-(-max_frames // 2), 8)))
    if frame_tile >= max_frames:
        frame_tile = max_frames       # single full tile (full-dim block, any size)

    n_ft = pl.cdiv(max_frames, frame_tile)

    # Right-sized VMEM limit from actual block sizes (+ slack for compiler scratch).
    out_blk = frame_tile * D * itemsize
    x_blk = L * D * itemsize
    cum_blk = 2 * L * 4
    mask_blk = frame_tile * _round_up(L, 128) * 4
    need = 2 * out_blk + 2 * x_blk + 2 * cum_blk + 3 * mask_blk + (8 << 20)
    vmem_limit = int(min(max(need, 32 << 20), max(vmem_cap - (8 << 20), need)))

    # TODO(synk): window the L contraction per (batch, frame-tile) via scalar-prefetched
    # searchsorted indices once a safe static window bound is available.
    out = pl.pallas_call(
        _lr_expand_kernel,
        out_shape=jax.ShapeDtypeStruct((B, max_frames, D), x.dtype),
        grid_spec=pltpu.PrefetchScalarGridSpec(
            num_scalar_prefetch=1,                           # per-batch totals -> SMEM
            grid=(B, n_ft),
            in_specs=[
                pl.BlockSpec((1, 2, L), lambda b, f, tot: (b, 0, 0)),   # cumsums
                pl.BlockSpec((1, L, D), lambda b, f, tot: (b, 0, 0)),   # x[b]
            ],
            out_specs=pl.BlockSpec((1, frame_tile, D), lambda b, f, tot: (b, f, 0)),
        ),
        compiler_params=pltpu.CompilerParams(
            dimension_semantics=("parallel", "parallel"),
            vmem_limit_bytes=vmem_limit,
        ),
    )(total, cums, x)

    return out   # [B, max_frames, D] -- no trailing slice copy


# ---------------------------------------------------------------------------
# LengthRegulator.forward (inference path)
# ---------------------------------------------------------------------------
def length_regulator_forward(x, params, seq_length=None, max_frames=None):
    durations = duration_predictor(x, params)                # [B, L], exp()'d
    if seq_length is not None:
        # TODO(synk): gated by config.log_loss in the original module.
        L = durations.shape[1]
        dur_mask = jnp.arange(L)[None, :] < seq_length[:, None]
        durations = durations * dur_mask
    output = length_regulate(x, durations, max_frames=max_frames)
    return output, durations


# ---------------------------------------------------------------------------
# Pure-JAX / numpy references
# ---------------------------------------------------------------------------
def _reference_durations(x, params):
    def conv1d(xx, w, b):
        K = w.shape[0]
        P = K // 2
        Lx = xx.shape[1]
        xp = jnp.pad(xx, ((0, 0), (P, P), (0, 0)))
        out = b.reshape(1, 1, -1)
        for k in range(K):
            out = out + jnp.einsum("blc,cd->bld", xp[:, k:k + Lx, :], w[k],
                                   precision="highest")
        return out

    def layernorm(h, g, beta):
        mu = jnp.mean(h, -1, keepdims=True)
        var = jnp.mean(jnp.square(h - mu), -1, keepdims=True)
        return (h - mu) / jnp.sqrt(var + _LN_EPS) * g.reshape(1, 1, -1) + beta.reshape(1, 1, -1)

    h = layernorm(jnp.maximum(conv1d(x, params["w1"], params["b1"]), 0.0),
                  params["g1"], params["beta1"])
    h = layernorm(jnp.maximum(conv1d(h, params["w2"], params["b2"]), 0.0),
                  params["g2"], params["beta2"])
    pred = jnp.sum(h * params["w3"].reshape(1, 1, -1), -1) + params["b3"].reshape(1, 1)
    return jnp.exp(pred)                                   # [B, L]


def _reference_lr(x, durations_float, max_len=None):
    """Literal port of the PyTorch LR_function (valid=True)."""
    xn = np.asarray(x)
    dn_f = np.asarray(durations_float)
    B, L, D = xn.shape
    if max_len is None:
        max_len = max(int(np.max(np.sum(dn_f, axis=-1))), 1)
    dn = np.round(dn_f).astype(np.int64)
    out = np.zeros((B, max_len, D), dtype=xn.dtype)
    for i in range(B):
        count = 0
        for j in range(L):
            d = int(dn[i, j])
            out[i, count:count + d] = xn[i, j]
            count += d
    return out


if __name__ == "__main__":
    key = jax.random.PRNGKey(0)
    B, L = 2, 16
    D_IN, D_HID, D_OUT, K = 128, 64, 32, 3
    ks = jax.random.split(key, 4)

    x = jax.random.normal(ks[0], (B, L, D_IN), dtype=jnp.float32)
    params = {
        "w1": 0.1 * jax.random.normal(ks[1], (K, D_IN, D_HID), dtype=jnp.float32),
        "b1": jnp.zeros((1, D_HID), jnp.float32),
        "g1": jnp.ones((1, D_HID), jnp.float32),
        "beta1": jnp.zeros((1, D_HID), jnp.float32),
        "w2": 0.1 * jax.random.normal(ks[2], (K, D_HID, D_OUT), dtype=jnp.float32),
        "b2": jnp.zeros((1, D_OUT), jnp.float32),
        "g2": jnp.ones((1, D_OUT), jnp.float32),
        "beta2": jnp.zeros((1, D_OUT), jnp.float32),
        "w3": 0.1 * jax.random.normal(ks[3], (1, D_OUT), dtype=jnp.float32),
        "b3": jnp.full((1, 1), 0.7, jnp.float32),
    }

    out, durations = length_regulator_forward(x, params)
    out = jax.block_until_ready(out)
    durations = jax.block_until_ready(durations)

    # 1) duration predictor matches the pure-JAX reference
    dur_ref = _reference_durations(x, params)
    assert durations.shape == (B, L)
    assert jnp.allclose(durations, dur_ref, atol=5e-2, rtol=5e-2), "duration predictor mismatch"

    # 2) expansion matches the literal LR_function loop (built from the same durations)
    out_ref = _reference_lr(x, durations, max_len=out.shape[1])
    assert out.shape == out_ref.shape, (out.shape, out_ref.shape)
    assert jnp.allclose(out, jnp.asarray(out_ref), atol=3e-2, rtol=3e-2), "LR expansion mismatch"

    print("KERNEL_OK")
</pallas_src>

<mosaic_0001>
module attributes {stable_mosaic.version = 11 : i64} {
  func.func @_dp_fused_kernel(%arg0: i32, %arg1: memref<1x384x16xf32, #tpu.memory_space<vmem>>, %arg2: memref<64x384xf32, #tpu.memory_space<vmem>>, %arg3: memref<64x1xf32, #tpu.memory_space<vmem>>, %arg4: memref<64x1xf32, #tpu.memory_space<vmem>>, %arg5: memref<64x1xf32, #tpu.memory_space<vmem>>, %arg6: memref<3x32x64xf32, #tpu.memory_space<vmem>>, %arg7: memref<32x1xf32, #tpu.memory_space<vmem>>, %arg8: memref<32x1xf32, #tpu.memory_space<vmem>>, %arg9: memref<32x1xf32, #tpu.memory_space<vmem>>, %arg10: memref<1x32xf32, #tpu.memory_space<vmem>>, %arg11: memref<1x1xf32, #tpu.memory_space<vmem>>, %arg12: memref<1x1x16xf32, #tpu.memory_space<vmem>>) attributes {dimension_semantics = [#tpu.dimension_semantics<parallel>], iteration_bounds = array<i64: 2>, scalar_prefetch = 0 : i64, scratch_operands = 0 : i64, tpu.core_type = #tpu.core_type<tc>, window_params = [{transform_indices = @transform_0, window_bounds = array<i64: 1, 384, 16>}, {pipeline_mode = #tpu.pipeline_mode<synchronous>, transform_indices = @transform_1, window_bounds = array<i64: 64, 384>}, {pipeline_mode = #tpu.pipeline_mode<synchronous>, transform_indices = @transform_2, window_bounds = array<i64: 64, 1>}, {pipeline_mode = #tpu.pipeline_mode<synchronous>, transform_indices = @transform_3, window_bounds = array<i64: 64, 1>}, {pipeline_mode = #tpu.pipeline_mode<synchronous>, transform_indices = @transform_4, window_bounds = array<i64: 64, 1>}, {pipeline_mode = #tpu.pipeline_mode<synchronous>, transform_indices = @transform_5, window_bounds = array<i64: 3, 32, 64>}, {pipeline_mode = #tpu.pipeline_mode<synchronous>, transform_indices = @transform_6, window_bounds = array<i64: 32, 1>}, {pipeline_mode = #tpu.pipeline_mode<synchronous>, transform_indices = @transform_7, window_bounds = array<i64: 32, 1>}, {pipeline_mode = #tpu.pipeline_mode<synchronous>, transform_indices = @transform_8, window_bounds = array<i64: 32, 1>}, {pipeline_mode = #tpu.pipeline_mode<synchronous>, transform_indices = @transform_9, window_bounds = array<i64: 1, 32>}, {pipeline_mode = #tpu.pipeline_mode<synchronous>, transform_indices = @transform_10, window_bounds = array<i64: 1, 1>}, {transform_indices = @transform_11, window_bounds = array<i64: 1, 1, 16>}]} {
    %c0 = arith.constant 0 : index
    %c0_0 = arith.constant 0 : index
    %0 = vector.load %arg2[%c0, %c0_0] : memref<64x384xf32, #tpu.memory_space<vmem>>, vector<64x384xf32>
    %c0_1 = arith.constant 0 : index
    %c0_2 = arith.constant 0 : index
    %c0_3 = arith.constant 0 : index
    %1 = vector.load %arg1[%c0_1, %c0_2, %c0_3] : memref<1x384x16xf32, #tpu.memory_space<vmem>>, vector<1x384x16xf32>
    %2 = vector.shape_cast %1 : vector<1x384x16xf32> to vector<384x16xf32>
    %cst = arith.constant dense<0.000000e+00> : vector<64x16xf32>
    %3 = tpu.matmul %0, %2, %cst {dimension_numbers = #tpu.dot_dimension_numbers<[1], [0], [0], [1], [0, 0, 1, 1], [], []>} : vector<64x384xf32>, vector<384x16xf32>, vector<64x16xf32> -> vector<64x16xf32>
    %c0_4 = arith.constant 0 : index
    %c0_5 = arith.constant 0 : index
    %4 = vector.load %arg3[%c0_4, %c0_5] : memref<64x1xf32, #tpu.memory_space<vmem>>, vector<64x1xf32>
    %5 = vector.broadcast %4 : vector<64x1xf32> to vector<64x16xf32>
    %6 = arith.addf %3, %5 : vector<64x16xf32>
    %cst_6 = arith.constant 0.000000e+00 : f32
    %7 = vector.broadcast %cst_6 : f32 to vector<64x16xf32>
    %8 = arith.maximumf %6, %7 : vector<64x16xf32>
    %c0_7 = arith.constant 0 : index
    %c0_8 = arith.constant 0 : index
    %9 = vector.load %arg4[%c0_7, %c0_8] : memref<64x1xf32, #tpu.memory_space<vmem>>, vector<64x1xf32>
    %c0_9 = arith.constant 0 : index
    %c0_10 = arith.constant 0 : index
    %10 = vector.load %arg5[%c0_9, %c0_10] : memref<64x1xf32, #tpu.memory_space<vmem>>, vector<64x1xf32>
    %cst_11 = arith.constant dense<0.000000e+00> : vector<16xf32>
    %11 = vector.multi_reduction <add>, %8, %cst_11 [0] : vector<64x16xf32> to vector<16xf32>
    %12 = vector.shape_cast %11 : vector<16xf32> to vector<1x16xf32>
    %cst_12 = arith.constant 6.400000e+01 : f32
    %13 = vector.broadcast %cst_12 : f32 to vector<1x16xf32>
    %14 = arith.divf %12, %13 : vector<1x16xf32>
    %15 = vector.broadcast %14 : vector<1x16xf32> to vector<64x16xf32>
    %16 = arith.subf %8, %15 : vector<64x16xf32>
    %17 = arith.mulf %16, %16 : vector<64x16xf32>
    %cst_13 = arith.constant dense<0.000000e+00> : vector<16xf32>
    %18 = vector.multi_reduction <add>, %17, %cst_13 [0] : vector<64x16xf32> to vector<16xf32>
    %19 = vector.shape_cast %18 : vector<16xf32> to vector<1x16xf32>
    %cst_14 = arith.constant 6.400000e+01 : f32
    %20 = vector.broadcast %cst_14 : f32 to vector<1x16xf32>
    %21 = arith.divf %19, %20 : vector<1x16xf32>
    %22 = vector.broadcast %14 : vector<1x16xf32> to vector<64x16xf32>
    %23 = arith.subf %8, %22 : vector<64x16xf32>
    %cst_15 = arith.constant 9.99999974E-6 : f32
    %24 = vector.broadcast %cst_15 : f32 to vector<1x16xf32>
    %25 = arith.addf %21, %24 : vector<1x16xf32>
    %26 = math.rsqrt %25 : vector<1x16xf32>
    %27 = vector.broadcast %26 : vector<1x16xf32> to vector<64x16xf32>
    %28 = arith.mulf %23, %27 : vector<64x16xf32>
    %29 = vector.broadcast %9 : vector<64x1xf32> to vector<64x16xf32>
    %30 = arith.mulf %28, %29 : vector<64x16xf32>
    %31 = vector.broadcast %10 : vector<64x1xf32> to vector<64x16xf32>
    %32 = arith.addf %30, %31 : vector<64x16xf32>
    %cst_16 = arith.constant 0.000000e+00 : f32
    %33 = vector.broadcast %cst_16 : f32 to vector<64x1xf32>
    %34 = tpu.concatenate %33, %32, %33 in 1 : vector<64x1xf32>, vector<64x16xf32>, vector<64x1xf32> -> vector<64x18xf32>
    %cst_17 = arith.constant 0.000000e+00 : f32
    %35 = vector.broadcast %cst_17 : f32 to vector<32x16xf32>
    %c0_18 = arith.constant 0 : index
    %c0_19 = arith.constant 0 : index
    %c0_20 = arith.constant 0 : index
    %36 = vector.load %arg6[%c0_18, %c0_19, %c0_20] : memref<3x32x64xf32, #tpu.memory_space<vmem>>, vector<1x32x64xf32>
    %37 = vector.shape_cast %36 : vector<1x32x64xf32> to vector<32x64xf32>
    %38 = vector.extract_strided_slice %34 {offsets = [0, 0], sizes = [64, 16], strides = [1, 1]} : vector<64x18xf32> to vector<64x16xf32>
    %cst_21 = arith.constant dense<0.000000e+00> : vector<32x16xf32>
    %39 = tpu.matmul %37, %38, %cst_21 {dimension_numbers = #tpu.dot_dimension_numbers<[1], [0], [0], [1], [0, 0, 1, 1], [], []>} : vector<32x64xf32>, vector<64x16xf32>, vector<32x16xf32> -> vector<32x16xf32>
    %40 = arith.addf %35, %39 : vector<32x16xf32>
    %c1 = arith.constant 1 : index
    %c0_22 = arith.constant 0 : index
    %c0_23 = arith.constant 0 : index
    %41 = vector.load %arg6[%c1, %c0_22, %c0_23] : memref<3x32x64xf32, #tpu.memory_space<vmem>>, vector<1x32x64xf32>
    %42 = vector.shape_cast %41 : vector<1x32x64xf32> to vector<32x64xf32>
    %43 = vector.extract_strided_slice %34 {offsets = [0, 1], sizes = [64, 16], strides = [1, 1]} : vector<64x18xf32> to vector<64x16xf32>
    %cst_24 = arith.constant dense<0.000000e+00> : vector<32x16xf32>
    %44 = tpu.matmul %42, %43, %cst_24 {dimension_numbers = #tpu.dot_dimension_numbers<[1], [0], [0], [1], [0, 0, 1, 1], [], []>} : vector<32x64xf32>, vector<64x16xf32>, vector<32x16xf32> -> vector<32x16xf32>
    %45 = arith.addf %40, %44 : vector<32x16xf32>
    %c2 = arith.constant 2 : index
    %c0_25 = arith.constant 0 : index
    %c0_26 = arith.constant 0 : index
    %46 = vector.load %arg6[%c2, %c0_25, %c0_26] : memref<3x32x64xf32, #tpu.memory_space<vmem>>, vector<1x32x64xf32>
    %47 = vector.shape_cast %46 : vector<1x32x64xf32> to vector<32x64xf32>
    %48 = vector.extract_strided_slice %34 {offsets = [0, 2], sizes = [64, 16], strides = [1, 1]} : vector<64x18xf32> to vector<64x16xf32>
    %cst_27 = arith.constant dense<0.000000e+00> : vector<32x16xf32>
    %49 = tpu.matmul %47, %48, %cst_27 {dimension_numbers = #tpu.dot_dimension_numbers<[1], [0], [0], [1], [0, 0, 1, 1], [], []>} : vector<32x64xf32>, vector<64x16xf32>, vector<32x16xf32> -> vector<32x16xf32>
    %50 = arith.addf %45, %49 : vector<32x16xf32>
    %c0_28 = arith.constant 0 : index
    %c0_29 = arith.constant 0 : index
    %51 = vector.load %arg7[%c0_28, %c0_29] : memref<32x1xf32, #tpu.memory_space<vmem>>, vector<32x1xf32>
    %52 = vector.broadcast %51 : vector<32x1xf32> to vector<32x16xf32>
    %53 = arith.addf %50, %52 : vector<32x16xf32>
    %cst_30 = arith.constant 0.000000e+00 : f32
    %54 = vector.broadcast %cst_30 : f32 to vector<32x16xf32>
    %55 = arith.maximumf %53, %54 : vector<32x16xf32>
    %c0_31 = arith.constant 0 : index
    %c0_32 = arith.constant 0 : index
    %56 = vector.load %arg8[%c0_31, %c0_32] : memref<32x1xf32, #tpu.memory_space<vmem>>, vector<32x1xf32>
    %c0_33 = arith.constant 0 : index
    %c0_34 = arith.constant 0 : index
    %57 = vector.load %arg9[%c0_33, %c0_34] : memref<32x1xf32, #tpu.memory_space<vmem>>, vector<32x1xf32>
    %cst_35 = arith.constant dense<0.000000e+00> : vector<16xf32>
    %58 = vector.multi_reduction <add>, %55, %cst_35 [0] : vector<32x16xf32> to vector<16xf32>
    %59 = vector.shape_cast %58 : vector<16xf32> to vector<1x16xf32>
    %cst_36 = arith.constant 3.200000e+01 : f32
    %60 = vector.broadcast %cst_36 : f32 to vector<1x16xf32>
    %61 = arith.divf %59, %60 : vector<1x16xf32>
    %62 = vector.broadcast %61 : vector<1x16xf32> to vector<32x16xf32>
    %63 = arith.subf %55, %62 : vector<32x16xf32>
    %64 = arith.mulf %63, %63 : vector<32x16xf32>
    %cst_37 = arith.constant dense<0.000000e+00> : vector<16xf32>
    %65 = vector.multi_reduction <add>, %64, %cst_37 [0] : vector<32x16xf32> to vector<16xf32>
    %66 = vector.shape_cast %65 : vector<16xf32> to vector<1x16xf32>
    %cst_38 = arith.constant 3.200000e+01 : f32
    %67 = vector.broadcast %cst_38 : f32 to vector<1x16xf32>
    %68 = arith.divf %66, %67 : vector<1x16xf32>
    %69 = vector.broadcast %61 : vector<1x16xf32> to vector<32x16xf32>
    %70 = arith.subf %55, %69 : vector<32x16xf32>
    %cst_39 = arith.constant 9.99999974E-6 : f32
    %71 = vector.broadcast %cst_39 : f32 to vector<1x16xf32>
    %72 = arith.addf %68, %71 : vector<1x16xf32>
    %73 = math.rsqrt %72 : vector<1x16xf32>
    %74 = vector.broadcast %73 : vector<1x16xf32> to vector<32x16xf32>
    %75 = arith.mulf %70, %74 : vector<32x16xf32>
    %76 = vector.broadcast %56 : vector<32x1xf32> to vector<32x16xf32>
    %77 = arith.mulf %75, %76 : vector<32x16xf32>
    %78 = vector.broadcast %57 : vector<32x1xf32> to vector<32x16xf32>
    %79 = arith.addf %77, %78 : vector<32x16xf32>
    %c0_40 = arith.constant 0 : index
    %c0_41 = arith.constant 0 : index
    %80 = vector.load %arg10[%c0_40, %c0_41] : memref<1x32xf32, #tpu.memory_space<vmem>>, vector<1x32xf32>
    %cst_42 = arith.constant dense<0.000000e+00> : vector<1x16xf32>
    %81 = tpu.matmul %80, %79, %cst_42 {dimension_numbers = #tpu.dot_dimension_numbers<[1], [0], [0], [1], [0, 0, 1, 1], [], []>} : vector<1x32xf32>, vector<32x16xf32>, vector<1x16xf32> -> vector<1x16xf32>
    %c0_43 = arith.constant 0 : index
    %c0_44 = arith.constant 0 : index
    %82 = vector.load %arg11[%c0_43, %c0_44] : memref<1x1xf32, #tpu.memory_space<vmem>>, vector<1x1xf32>
    %83 = vector.broadcast %82 : vector<1x1xf32> to vector<1x16xf32>
    %84 = arith.addf %81, %83 : vector<1x16xf32>
    %85 = math.exp %84 : vector<1x16xf32>
    %c0_45 = arith.constant 0 : index
    %c0_46 = arith.constant 0 : index
    %c0_47 = arith.constant 0 : index
    %86 = vector.load %arg12[%c0_45, %c0_46, %c0_47] : memref<1x1x16xf32, #tpu.memory_space<vmem>>, vector<1x1x16xf32>
    %87 = vector.shape_cast %86 : vector<1x1x16xf32> to vector<1x16xf32>
    %88 = vector.shape_cast %85 : vector<1x16xf32> to vector<1x1x16xf32>
    tpu.vector_store %arg12[%c0_45, %c0_46, %c0_47], %88 {strides = array<i32>} : memref<1x1x16xf32, #tpu.memory_space<vmem>>, vector<1x1x16xf32>,
    return
  }
  func.func @transform_0(%arg0: i32) -> (i32, i32, i32) {
    %c0_i32 = arith.constant 0 : i32
    %c0_i32_0 = arith.constant 0 : i32
    %c0_i32_1 = arith.constant 0 : i32
    return %arg0, %c0_i32, %c0_i32_0 : i32, i32, i32
  }
  func.func @transform_1(%arg0: i32) -> (i32, i32) {
    %c0_i32 = arith.constant 0 : i32
    %c0_i32_0 = arith.constant 0 : i32
    %c0_i32_1 = arith.constant 0 : i32
    return %c0_i32, %c0_i32_0 : i32, i32
  }
  func.func @transform_2(%arg0: i32) -> (i32, i32) {
    %c0_i32 = arith.constant 0 : i32
    %c0_i32_0 = arith.constant 0 : i32
    %c0_i32_1 = arith.constant 0 : i32
    return %c0_i32, %c0_i32_0 : i32, i32
  }
  func.func @transform_3(%arg0: i32) -> (i32, i32) {
    %c0_i32 = arith.constant 0 : i32
    %c0_i32_0 = arith.constant 0 : i32
    %c0_i32_1 = arith.constant 0 : i32
    return %c0_i32, %c0_i32_0 : i32, i32
  }
  func.func @transform_4(%arg0: i32) -> (i32, i32) {
    %c0_i32 = arith.constant 0 : i32
    %c0_i32_0 = arith.constant 0 : i32
    %c0_i32_1 = arith.constant 0 : i32
    return %c0_i32, %c0_i32_0 : i32, i32
  }
  func.func @transform_5(%arg0: i32) -> (i32, i32, i32) {
    %c0_i32 = arith.constant 0 : i32
    %c0_i32_0 = arith.constant 0 : i32
    %c0_i32_1 = arith.constant 0 : i32
    %c0_i32_2 = arith.constant 0 : i32
    return %c0_i32, %c0_i32_0, %c0_i32_1 : i32, i32, i32
  }
  func.func @transform_6(%arg0: i32) -> (i32, i32) {
    %c0_i32 = arith.constant 0 : i32
    %c0_i32_0 = arith.constant 0 : i32
    %c0_i32_1 = arith.constant 0 : i32
    return %c0_i32, %c0_i32_0 : i32, i32
  }
  func.func @transform_7(%arg0: i32) -> (i32, i32) {
    %c0_i32 = arith.constant 0 : i32
    %c0_i32_0 = arith.constant 0 : i32
    %c0_i32_1 = arith.constant 0 : i32
    return %c0_i32, %c0_i32_0 : i32, i32
  }
  func.func @transform_8(%arg0: i32) -> (i32, i32) {
    %c0_i32 = arith.constant 0 : i32
    %c0_i32_0 = arith.constant 0 : i32
    %c0_i32_1 = arith.constant 0 : i32
    return %c0_i32, %c0_i32_0 : i32, i32
  }
  func.func @transform_9(%arg0: i32) -> (i32, i32) {
    %c0_i32 = arith.constant 0 : i32
    %c0_i32_0 = arith.constant 0 : i32
    %c0_i32_1 = arith.constant 0 : i32
    return %c0_i32, %c0_i32_0 : i32, i32
  }
  func.func @transform_10(%arg0: i32) -> (i32, i32) {
    %c0_i32 = arith.constant 0 : i32
    %c0_i32_0 = arith.constant 0 : i32
    %c0_i32_1 = arith.constant 0 : i32
    return %c0_i32, %c0_i32_0 : i32, i32
  }
  func.func @transform_11(%arg0: i32) -> (i32, i32, i32) {
    %c0_i32 = arith.constant 0 : i32
    %c0_i32_0 = arith.constant 0 : i32
    %c0_i32_1 = arith.constant 0 : i32
    return %arg0, %c0_i32, %c0_i32_0 : i32, i32, i32
  }
}

</mosaic_0001>

<bundles_post_ra>
// kernel: tpu_custom_call.1
= control target key start
LH: loop header
LB: loop body
LE: loop exit
PB: predicated region body
PF: predicated region fallthrough
CT: control target
= control target key end

     0   :  { %s2533_s0 = inlined_call_operand.vmem [shape: f32[2,384,16], index: 0, kind: input, shape index: {}]   ;;  %s2534_s1 = inlined_call_operand.vmem [shape: f32[64,384], index: 1, kind: input, shape index: {}]   ;;  %s2535_s2 = inlined_call_operand.vmem [shape: f32[64,1], index: 2, kind: input, shape index: {}]   ;;  %s2536_s3 = inlined_call_operand.vmem [shape: f32[64,1], index: 3, kind: input, shape index: {}]   ;;  %s2537_s4 = inlined_call_operand.vmem [shape: f32[64,1], index: 4, kind: input, shape index: {}]   ;;  %s2538_s5 = inlined_call_operand.vmem [shape: f32[3,32,64], index: 5, kind: input, shape index: {}]   ;;  %s2539_s6 = inlined_call_operand.vmem [shape: f32[32,1], index: 6, kind: input, shape index: {}]   ;;  %s2540_s7 = inlined_call_operand.vmem [shape: f32[32,1], index: 7, kind: input, shape index: {}]   ;;  %s2541_s8 = inlined_call_operand.vmem [shape: f32[32,1], index: 8, kind: input, shape index: {}]   ;;  %s2542_s9 = inlined_call_operand.vmem [shape: f32[1,32], index: 9, kind: input, shape index: {}]   ;;  %s2543_s10 = inlined_call_operand.<no memory space> [shape: f32[1,1], index: 10, kind: input, shape index: {}]   ;;  %s2544_s11 = inlined_call_operand.hbm [shape: f32[2,1,16], index: 11, kind: output, shape index: {}]  }
   0x1   :  { %v16_v0 = vstv %s2543_s10 }
   0x2   :  { %17 = vst [vmem:[#allocation2] sm:$0x1] %v16_v0 }
   0x3   :  { %18 = vsyncpa [#allocation4], 0 }
   0x4   :  { %20 = vsyncpa [#allocation4 + $0x1], 0  ;;  %s2077_s19 = smov 0   ;;  %s2079_s20 = smov 0  }
   0x5   :  { %s2081_s21 = smov 0   ;;  %s2083_s22 = smov 0  }
   0x6 LB: > { %s2098_s10 = sadd.s32 4294967295, %s2005_s22   ;;  %s1612_s23 = sadd.s32 4294967294, %s2005_s22   ;;  %s2005_s22 = sphi %s2083_s22, %s2550_s22   ;;  %s2001_s21 = sphi %s2081_s21, %s2549_s21   ;;  %s1997_s20 = sphi %s2079_s20, %s2548_s20   ;;  %s1993_s19 = sphi %s2077_s19, %s2547_s19  }
   0x7   : > { %s2102_s24 = sadd.s32 1, %s2005_s22   ;;  %s269_s25 = sadd.s32 1, %s2001_s21 }
   0x8   : > { %s266_s26 = ssub.s32 %s2005_s22, %s2102_s24  ;;  %p279_p0 = scmp.ne.s32.totalorder %s2001_s21, %s1997_s20 }
   0x9   : > { %p267_p1 = scmp.eq.s32.totalorder %s266_s26, 0  ;;  %p280_p2 = scmp.eq.s32.totalorder %s2098_s10, 1 }
   0xa   : > { %p285_p3 = scmp.ne.s32.totalorder %s1997_s20, %s1993_s19  ;;  %p286_p4 = scmp.eq.s32.totalorder %s1612_s23, 1 }
   0xb   : > { %s2113_s27 = scalar_select %p267_p1, %s2001_s21, %s269_s25  }
   0xc   : > { %p2115_p5 = por %p280_p2, %p279_p0  ;;  %p2119_p6 = por %p286_p4, %p285_p3 }
   0xd   : > { %p1615_p7 = scmp.ge.s32.totalorder %s2005_s22, 1  ;;  %p342_p8 = scmp.lt.s32.totalorder %s2005_s22, 3 }
   0xf   : > { %p343_p9 = pnand %p1615_p7, %p342_p8 }
  0x10   : > { %p381_p10 = scmp.lt.s32.totalorder (!%p343_p9), %s2098_s10, 1  ;;  %s2008_s13 = smov (!%p343_p9), 1  }
  0x11   : > { %346 = sbr.rel (%p343_p9) target bundleno = 1129 (0x469), region = 64  ;;  %s2009_s14 = smov (!%p343_p9), 127  }
  0x12   : > { %s2010_s12 = smov (!%p343_p9), 126   ;;  %s379_s30 = sand.u32 (!%p343_p9), 1, %s1997_s20  }
  0x13   : > { %s1545_s18 = scalar_lea.sflag (!%p343_p9), [#allocation4], %s379_s30  ;;  %s2013_s25 = smov (!%p343_p9), [#allocation3]  }
  0x14   : > { %s1949_s26 = sshll.u32 (!%p343_p9), %s2013_s25, 4  ;;  %s1950_s26 = int_to_ptr.vmem [resolvable:$false] %s1949_s26 }
  0x16   : > { %v387_v1 = vld [vmem:[%s2534_s1 + $0x8] sm:$0xff]  ;;  %v388_v2 = vld [vmem:[%s2534_s1 + $0x10] sm:$0xff]  ;;  %v2007_v3 = vmov 0   ;;  %s382_s15 = scalar_select %p381_p10, %s2098_s10, 1  ;;  %v386_v52 = vld [vmem:[%s2534_s1] sm:$0xff]  ;;  %vm740_vm0 = vcmask 130048  }
  0x17   : > { %570 = vmatprep.mubr.f32.mxu0 %v387_v1  ;;  %1937 = vset.pattern.permute.xlu0 %v2007_v3  ;;  %v390_v53 = vld [vmem:[%s2534_s1 + $0x20] sm:$0xff]  ;;  %v391_v54 = vld [vmem:[%s2534_s1 + $0x28] sm:$0xff]  ;;  %v460_v57 = vld [vmem:[%s2535_s2 + $0x10] sm:$0xff]  ;;  %vm940_vm1 = vcmask 7168   ;;  %vm949_vm2 = vcmask 138240   ;;  %vm999_vm3 = vcmask 523264  }
  0x18   : > { %1802 = vmatprep.mubr.f32.mxu1 %v388_v2  ;;  %1938 = vset.pattern.permute.xlu1 %v2007_v3  ;;  %s1891_s16 = smul.u32 384, %s382_s15  ;;  %v394_v55 = vld [vmem:[%s2534_s1 + $0x40] sm:$0xff]  ;;  %v389_v58 = vld [vmem:[%s2534_s1 + $0x18] sm:$0xff]  ;;  %v400_v61 = vld [vmem:[%s2534_s1 + $0x70] sm:$0xff]  ;;  %vm2012_vm4 = vmmov 0   ;;  %vm1466_vm5 = vcmask 261120  }
  0x19   : > { %v458_v56 = vld [vmem:[%s2535_s2] sm:$0xff]  ;;  %v393_v59 = vld [vmem:[%s2534_s1 + $0x38] sm:$0xff]  ;;  %478 = vperm.xlu1 %1938, %v460_v57   ;;  %v459_v62 = vld [vmem:[%s2535_s2 + $0x8] sm:$0xff]  ;;  %vm1542_vm6 = vcmask 122880  }
  0x1a   : > { %s2136_s23 = scalar_lea.vmem %s2533_s0, %s1891_s16  ;;  %v397_v60 = vld [vmem:[%s2534_s1 + $0x58] sm:$0xff]  ;;  %468 = vperm.xlu0 %1937, %v458_v56   ;;  %v392_v0 = vld [vmem:[%s2534_s1 + $0x30] sm:$0xff]  ;;  %v403_v2 = vld [vmem:[%s2534_s1 + $0x88] sm:$0xff] }
  0x1b   : > { %v441_v4 = vld [vmem:[%s2136_s23 + $0xf8] sm:$0xff]  ;;  %v440_v6 = vld [vmem:[%s2136_s23 + $0xf0] sm:$0xff]  ;;  %v439_v9 = vld [vmem:[%s2136_s23 + $0xe8] sm:$0xff] }
  0x1c   : > { %v425_v5 = vld [vmem:[%s2136_s23 + $0x78] sm:$0xff]  ;;  %1649 = vmatprep.subr.mxu0 %v441_v4  ;;  %v424_v7 = vld [vmem:[%s2136_s23 + $0x70] sm:$0xff]  ;;  %v423_v11 = vld [vmem:[%s2136_s23 + $0x68] sm:$0xff] }
  0x1d   : > { %v457_v8 = vld [vmem:[%s2136_s23 + $0x178] sm:$0xff]  ;;  %1650 = vmatpush3.msra.mxu0 %v425_v5  ;;  %v456_v10 = vld [vmem:[%s2136_s23 + $0x170] sm:$0xff]  ;;  %v455_v12 = vld [vmem:[%s2136_s23 + $0x168] sm:$0xff] }
  0x1e   : > { %1770 = vmatprep.subr.mxu1 %v457_v8  ;;  %1651 = vmatprep.subr.mxu0 %v440_v6  ;;  %v438_v13 = vld [vmem:[%s2136_s23 + $0xe0] sm:$0xff]  ;;  %v437_v16 = vld [vmem:[%s2136_s23 + $0xd8] sm:$0xff]  ;;  %v436_v19 = vld [vmem:[%s2136_s23 + $0xd0] sm:$0xff] }
  0x1f   : > { %1771 = vmatpush3.msra.mxu1 %v457_v8  ;;  %1652 = vmatpush3.msra.mxu0 %v424_v7  ;;  %v422_v14 = vld [vmem:[%s2136_s23 + $0x60] sm:$0xff]  ;;  %v421_v17 = vld [vmem:[%s2136_s23 + $0x58] sm:$0xff]  ;;  %v420_v20 = vld [vmem:[%s2136_s23 + $0x50] sm:$0xff] }
  0x20   : > { %1772 = vmatprep.subr.mxu1 %v456_v10  ;;  %1653 = vmatprep.subr.mxu0 %v439_v9  ;;  %v454_v15 = vld [vmem:[%s2136_s23 + $0x160] sm:$0xff]  ;;  %v453_v18 = vld [vmem:[%s2136_s23 + $0x158] sm:$0xff]  ;;  %v452_v21 = vld [vmem:[%s2136_s23 + $0x150] sm:$0xff] }
  0x21   : > { %1773 = vmatpush3.msra.mxu1 %v456_v10  ;;  %1654 = vmatpush3.msra.mxu0 %v423_v11  ;;  %v435_v22 = vld [vmem:[%s2136_s23 + $0xc8] sm:$0xff]  ;;  %v434_v25 = vld [vmem:[%s2136_s23 + $0xc0] sm:$0xff]  ;;  %v433_v28 = vld [vmem:[%s2136_s23 + $0xb8] sm:$0xff] }
  0x22   : > { %1774 = vmatprep.subr.mxu1 %v455_v12  ;;  %1655 = vmatprep.subr.mxu0 %v438_v13  ;;  %v419_v23 = vld [vmem:[%s2136_s23 + $0x48] sm:$0xff]  ;;  %v418_v26 = vld [vmem:[%s2136_s23 + $0x40] sm:$0xff]  ;;  %v417_v29 = vld [vmem:[%s2136_s23 + $0x38] sm:$0xff] }
  0x23   : > { %1775 = vmatpush3.msra.mxu1 %v455_v12  ;;  %1656 = vmatpush3.msra.mxu0 %v422_v14  ;;  %v451_v24 = vld [vmem:[%s2136_s23 + $0x148] sm:$0xff]  ;;  %v450_v27 = vld [vmem:[%s2136_s23 + $0x140] sm:$0xff]  ;;  %v449_v30 = vld [vmem:[%s2136_s23 + $0x138] sm:$0xff] }
  0x24   : > { %1776 = vmatprep.subr.mxu1 %v454_v15  ;;  %1657 = vmatprep.subr.mxu0 %v437_v16  ;;  %v432_v31 = vld [vmem:[%s2136_s23 + $0xb0] sm:$0xff]  ;;  %v431_v34 = vld [vmem:[%s2136_s23 + $0xa8] sm:$0xff]  ;;  %v430_v37 = vld [vmem:[%s2136_s23 + $0xa0] sm:$0xff] }
  0x25   : > { %1777 = vmatpush3.msra.mxu1 %v454_v15  ;;  %1658 = vmatpush3.msra.mxu0 %v421_v17  ;;  %v416_v32 = vld [vmem:[%s2136_s23 + $0x30] sm:$0xff]  ;;  %v415_v35 = vld [vmem:[%s2136_s23 + $0x28] sm:$0xff]  ;;  %v414_v38 = vld [vmem:[%s2136_s23 + $0x20] sm:$0xff] }
  0x26   : > { %1778 = vmatprep.subr.mxu1 %v453_v18  ;;  %1659 = vmatprep.subr.mxu0 %v436_v19  ;;  %v448_v33 = vld [vmem:[%s2136_s23 + $0x130] sm:$0xff]  ;;  %v447_v36 = vld [vmem:[%s2136_s23 + $0x128] sm:$0xff]  ;;  %v446_v39 = vld [vmem:[%s2136_s23 + $0x120] sm:$0xff] }
  0x27   : > { %1779 = vmatpush3.msra.mxu1 %v453_v18  ;;  %1660 = vmatpush3.msra.mxu0 %v420_v20  ;;  %v429_v40 = vld [vmem:[%s2136_s23 + $0x98] sm:$0xff]  ;;  %v428_v43 = vld [vmem:[%s2136_s23 + $0x90] sm:$0xff]  ;;  %v427_v46 = vld [vmem:[%s2136_s23 + $0x88] sm:$0xff] }
  0x28   : > { %1780 = vmatprep.subr.mxu1 %v452_v21  ;;  %1661 = vmatprep.subr.mxu0 %v435_v22  ;;  %v413_v41 = vld [vmem:[%s2136_s23 + $0x18] sm:$0xff]  ;;  %v412_v44 = vld [vmem:[%s2136_s23 + $0x10] sm:$0xff]  ;;  %v411_v47 = vld [vmem:[%s2136_s23 + $0x8] sm:$0xff] }
  0x29   : > { %1781 = vmatpush3.msra.mxu1 %v452_v21  ;;  %1662 = vmatpush3.msra.mxu0 %v419_v23  ;;  %v445_v42 = vld [vmem:[%s2136_s23 + $0x118] sm:$0xff]  ;;  %v444_v45 = vld [vmem:[%s2136_s23 + $0x110] sm:$0xff]  ;;  %v443_v48 = vld [vmem:[%s2136_s23 + $0x108] sm:$0xff] }
  0x2a   : > { %1782 = vmatprep.subr.mxu1 %v451_v24  ;;  %1663 = vmatprep.subr.mxu0 %v434_v25  ;;  %v426_v49 = vld [vmem:[%s2136_s23 + $0x80] sm:$0xff]  ;;  %v461_v63 = vld [vmem:[%s2535_s2 + $0x18] sm:$0xff]  ;;  %v396_v1 = vld [vmem:[%s2534_s1 + $0x50] sm:$0xff] }
  0x2b   : > { %1783 = vmatpush3.msra.mxu1 %v451_v24  ;;  %1664 = vmatpush3.msra.mxu0 %v418_v26  ;;  %v410_v50 = vld [vmem:[%s2136_s23] sm:$0xff]  ;;  %v463_v5 = vld [vmem:[%s2535_s2 + $0x28] sm:$0xff]  ;;  %v409_v8 = vld [vmem:[%s2534_s1 + $0xb8] sm:$0xff] }
  0x2c   : > { %1784 = vmatprep.subr.mxu1 %v450_v27  ;;  %1665 = vmatprep.subr.mxu0 %v433_v28  ;;  %v442_v51 = vld [vmem:[%s2136_s23 + $0x100] sm:$0xff]  ;;  %v395_v6 = vld [vmem:[%s2534_s1 + $0x48] sm:$0xff]  ;;  %v464_v9 = vld [vmem:[%s2535_s2 + $0x30] sm:$0xff] }
  0x2d   : > { %1785 = vmatpush3.msra.mxu1 %v450_v27  ;;  %1666 = vmatpush3.msra.mxu0 %v417_v29  ;;  %v406_v3 = vld [vmem:[%s2534_s1 + $0xa0] sm:$0xff]  ;;  %v399_v7 = vld [vmem:[%s2534_s1 + $0x68] sm:$0xff]  ;;  %v465_v10 = vld [vmem:[%s2535_s2 + $0x38] sm:$0xff] }
  0x2e   : > { %1786 = vmatprep.subr.mxu1 %v449_v30  ;;  %1667 = vmatprep.subr.mxu0 %v432_v31  ;;  %v462_v4 = vld [vmem:[%s2535_s2 + $0x20] sm:$0xff]  ;;  %v731_v13 = vld [vmem:[%s2536_s3 + $0x38] sm:$0xff]  ;;  %v730_v14 = vld [vmem:[%s2536_s3 + $0x30] sm:$0xff] }
  0x2f   : > { %1787 = vmatpush3.msra.mxu1 %v449_v30  ;;  %1668 = vmatpush3.msra.mxu0 %v416_v32  ;;  %v398_v11 = vld [vmem:[%s2534_s1 + $0x60] sm:$0xff]  ;;  %v401_v15 = vld [vmem:[%s2534_s1 + $0x78] sm:$0xff]  ;;  %v729_v18 = vld [vmem:[%s2536_s3 + $0x28] sm:$0xff] }
  0x30   : > { %1788 = vmatprep.subr.mxu1 %v448_v33  ;;  %1669 = vmatprep.subr.mxu0 %v431_v34  ;;  %v402_v12 = vld [vmem:[%s2534_s1 + $0x80] sm:$0xff]  ;;  %v405_v16 = vld [vmem:[%s2534_s1 + $0x98] sm:$0xff]  ;;  %v404_v19 = vld [vmem:[%s2534_s1 + $0x90] sm:$0xff] }
  0x31   : > { %1789 = vmatpush3.msra.mxu1 %v448_v33  ;;  %1670 = vmatpush3.msra.mxu0 %v415_v35  ;;  %v739_v17 = vld [vmem:[%s2537_s4 + $0x38] sm:$0xff]  ;;  %v408_v20 = vld [vmem:[%s2534_s1 + $0xb0] sm:$0xff]  ;;  %v728_v22 = vld [vmem:[%s2536_s3 + $0x20] sm:$0xff] }
  0x32   : > { %1790 = vmatprep.subr.mxu1 %v447_v36  ;;  %1671 = vmatprep.subr.mxu0 %v430_v37  ;;  %v738_v21 = vld [vmem:[%s2537_s4 + $0x30] sm:$0xff]  ;;  %v407_v23 = vld [vmem:[%s2534_s1 + $0xa8] sm:$0xff]  ;;  %v727_v25 = vld [vmem:[%s2536_s3 + $0x18] sm:$0xff] }
  0x33   : > { %1791 = vmatpush3.msra.mxu1 %v447_v36  ;;  %1672 = vmatpush3.msra.mxu0 %v414_v38  ;;  %v737_v24 = vld [vmem:[%s2537_s4 + $0x28] sm:$0xff]  ;;  %v736_v26 = vld [vmem:[%s2537_s4 + $0x20] sm:$0xff]  ;;  %v726_v27 = vld [vmem:[%s2536_s3 + $0x10] sm:$0xff] }
  0x34   : > { %1792 = vmatprep.subr.mxu1 %v446_v39  ;;  %1673 = vmatprep.subr.mxu0 %v429_v40  ;;  %v735_v28 = vld [vmem:[%s2537_s4 + $0x18] sm:$0xff]  ;;  %v725_v29 = vld [vmem:[%s2536_s3 + $0x8] sm:$0xff]  ;;  %v734_v30 = vld [vmem:[%s2537_s4 + $0x10] sm:$0xff] }
  0x35   : > { %1793 = vmatpush3.msra.mxu1 %v446_v39  ;;  %1674 = vmatpush3.msra.mxu0 %v413_v41  ;;  %v724_v31 = vld [vmem:[%s2536_s3] sm:$0xff]  ;;  %v733_v32 = vld [vmem:[%s2537_s4 + $0x8] sm:$0xff] }
  0x36   : > { %1794 = vmatprep.subr.mxu1 %v445_v42  ;;  %1675 = vmatprep.subr.mxu0 %v428_v43  ;;  %v732_v33 = vld [vmem:[%s2537_s4] sm:$0xff] }
  0x37   : > { %1795 = vmatpush3.msra.mxu1 %v445_v42  ;;  %1676 = vmatpush3.msra.mxu0 %v412_v44 }
  0x38   : > { %1796 = vmatprep.subr.mxu1 %v444_v45  ;;  %1677 = vmatprep.subr.mxu0 %v427_v46 }
  0x39   : > { %1797 = vmatpush3.msra.mxu1 %v444_v45  ;;  %1678 = vmatpush3.msra.mxu0 %v411_v47 }
  0x3a   : > { %1798 = vmatprep.subr.mxu1 %v443_v48  ;;  %1679 = vmatprep.subr.mxu0 %v426_v49 }
  0x3b   : > { %1799 = vmatpush3.msra.mxu1 %v443_v48  ;;  %1680 = vmatpush3.msra.mxu0 %v410_v50 }
  0x3c   : > { %1800 = vmatprep.subr.mxu1 %v442_v51  ;;  %571 = vmatmul.mubr.f32.vlgmr.msra.gmra.mxu0 %v386_v52 }
  0x3d   : > { %1801 = vmatpush3.msra.mxu1 %v442_v51  ;;  %575 = vmatprep.mubr.f32.mxu0 %v390_v53 }
  0x3e   : > { %1803 = vmatmul.mubr.f32.vlgmr.msra.gmra.mxu1 %v391_v54  ;;  %473 = vperm.xlu0 %1937, %v459_v62  }
  0x3f   : > { %1805 = vmatprep.mubr.f32.mxu1 %v394_v55  ;;  %483 = vperm.xlu1 %1938, %v461_v63  }
  0x40   : > { %576 = vmatmul.mubr.f32.gmra.mxu0 %v389_v58 }
  0x41   : > { %580 = vmatprep.mubr.f32.mxu0 %v393_v59 }
  0x42   : > { %1806 = vmatmul.mubr.f32.gmra.mxu1 %v397_v60  ;;  %488 = vperm.xlu0 %1937, %v462_v4  }
  0x43   : > { %1808 = vmatprep.mubr.f32.mxu1 %v400_v61  ;;  %493 = vperm.xlu1 %1938, %v463_v5  }
  0x44   : > { %581 = vmatmul.mubr.f32.gmra.mxu0 %v392_v0 }
  0x45   : > { %585 = vmatprep.mubr.f32.mxu0 %v396_v1 }
  0x46   : > { %1809 = vmatmul.mubr.f32.gmra.mxu1 %v403_v2  ;;  %498 = vperm.xlu0 %1937, %v464_v9  }
  0x47   : > { %1811 = vmatprep.mubr.f32.mxu1 %v406_v3  ;;  %503 = vperm.xlu1 %1938, %v465_v10  }
  0x48   : > { %586 = vmatmul.mubr.f32.gmra.mxu0 %v395_v6 }
  0x49   : > { %590 = vmatprep.mubr.f32.mxu0 %v399_v7 }
  0x4a   : > { %1812 = vmatmul.mubr.f32.gmra.mxu1 %v409_v8  ;;  %849 = vperm.xlu0 %1937, %v731_v13  }
  0x4b   : > { %844 = vperm.xlu1 %1938, %v730_v14  }
  0x4c   : > { %591 = vmatmul.mubr.f32.gmra.mxu0 %v398_v11 }
  0x4d   : > { %595 = vmatprep.mubr.f32.mxu0 %v402_v12 }
  0x4e   : > { %897 = vperm.xlu0 %1937, %v739_v17  }
  0x4f   : > { %839 = vperm.xlu1 %1938, %v729_v18  }
  0x50   : > { %596 = vmatmul.mubr.f32.gmra.mxu0 %v401_v15 }
  0x51   : > { %600 = vmatprep.mubr.f32.mxu0 %v405_v16 }
  0x52   : > { %892 = vperm.xlu0 %1937, %v738_v21  }
  0x53   : > { %834 = vperm.xlu1 %1938, %v728_v22  }
  0x54   : > { %601 = vmatmul.mubr.f32.gmra.mxu0 %v404_v19 }
  0x55   : > { %605 = vmatprep.mubr.f32.mxu0 %v408_v20 }
  0x56   : > { %887 = vperm.xlu0 %1937, %v737_v24  }
  0x57   : > { %829 = vperm.xlu1 %1938, %v727_v25  }
  0x58   : > { %606 = vmatmul.mubr.f32.gmra.mxu0 %v407_v23 }
  0x5a   : > { %882 = vperm.xlu0 %1937, %v736_v26  }
  0x5b   : > { %824 = vperm.xlu1 %1938, %v726_v27  }
  0x5e   : > { %877 = vperm.xlu0 %1937, %v735_v28  }
  0x5f   : > { %819 = vperm.xlu1 %1938, %v725_v29  }
  0x62   : > { %872 = vperm.xlu0 %1937, %v734_v30  }
  0x63   : > { %814 = vperm.xlu1 %1938, %v724_v31  }
  0x66   : > { %867 = vperm.xlu0 %1937, %v733_v32  }
  0x67   : > { %862 = vperm.xlu1 %1938, %v732_v33  }
  0x94   : > { %v479_v42 = vpop.permute.xlu1 %478 }
  0x95   : > { %v469_v38 = vpop.permute.xlu0 %468 }
  0xb9   : > { %v474_v48 = vpop.permute.xlu0 %473 }
  0xba   : > { %v484_v54 = vpop.permute.xlu1 %483 }
  0xbd   : > { %v489_v63 = vpop.permute.xlu0 %488 }
  0xbe   : > { %v494_v9 = vpop.permute.xlu1 %493 }
  0xc1   : > { %v499_v20 = vpop.permute.xlu0 %498 }
  0xfc   : > { %v1681_v34 = vpop.f32.mrf.mxu0 }
  0xfe   : > { %v1682_v35 = vpop.f32.mrf.mxu0  ;;  %v1804_v37 = vpop.f32.mrf.mxu1 }
  0xff   : > { %v1683_v44 = vadd.f32 %v1682_v35, %v1681_v34 }
 0x100   : > { %v1684_v36 = vpop.f32.mrf.mxu0  ;;  %v677_v40 = vpop.f32.mrf.mxu1 }
 0x101   : > { %v573_v51 = vadd.f32 %v1683_v44, %v469_v38 }
 0x102   : > { %v1685_v39 = vpop.f32.mrf.mxu0  ;;  %v1807_v46 = vpop.f32.mrf.mxu1 }
 0x103   : > { %v1686_v43 = vadd.f32 %v1685_v39, %v1684_v36  ;;  %v678_v61 = vadd.f32 %v677_v40, %v573_v51  ;;  %v504_v36 = vpop.permute.xlu1 %503 }
 0x104   : > { %v1687_v41 = vpop.f32.mrf.mxu0  ;;  %v687_v53 = vpop.f32.mrf.mxu1 }
 0x105   : > { %v578_v50 = vadd.f32 %v1686_v43, %v474_v48  ;;  %v716_v7 = vmax.f32 %v678_v61, 0.0 }
 0x106   : > { %v1688_v45 = vpop.f32.mrf.mxu0  ;;  %v1810_v58 = vpop.f32.mrf.mxu1 }
 0x107   : > { %v1689_v47 = vadd.f32 %v1688_v45, %v1687_v41  ;;  %v2324_v59 = vadd.f32 %v1804_v37, %v578_v50  ;;  %v741_v18 = vsel %vm740_vm0, %v716_v7, 0.0 }
 0x108   : > { %v1690_v49 = vpop.f32.mrf.mxu0  ;;  %v697_v3 = vpop.f32.mrf.mxu1 }
 0x109   : > { %v583_v56 = vadd.f32 %v1689_v47, %v479_v42  ;;  %v717_v4 = vmax.f32 %v2324_v59, 0.0 }
 0x10a   : > { %v1691_v52 = vpop.f32.mrf.mxu0  ;;  %v1813_v14 = vpop.f32.mrf.mxu1 }
 0x10b   : > { %v1692_v55 = vadd.f32 %v1691_v52, %v1690_v49  ;;  %v688_v0 = vadd.f32 %v687_v53, %v583_v56  ;;  %v742_v15 = vsel %vm740_vm0, %v717_v4, 0.0 }
 0x10c   : > { %v1693_v57 = vpop.f32.mrf.mxu0  ;;  %v743_v25 = vadd.f32 %v742_v15, %v741_v18  ;;  %v707_v27 = vpop.f32.mrf.mxu1 }
 0x10d   : > { %v588_v60 = vadd.f32 %v1692_v55, %v484_v54  ;;  %v718_v10 = vmax.f32 %v688_v0, 0.0 }
 0x10e   : > { %v1694_v62 = vpop.f32.mrf.mxu0 }
 0x10f   : > { %v1695_v1 = vadd.f32 %v1694_v62, %v1693_v57  ;;  %v693_v5 = vadd.f32 %v1807_v46, %v588_v60  ;;  %v744_v21 = vsel %vm740_vm0, %v718_v10, 0.0 }
 0x110   : > { %v1696_v2 = vpop.f32.mrf.mxu0  ;;  %v745_v31 = vadd.f32 %v744_v21, %v743_v25  ;;  %v850_v25 = vpop.permute.xlu0 %849 }
 0x111   : > { %v593_v6 = vadd.f32 %v1695_v1, %v489_v63  ;;  %v719_v16 = vmax.f32 %v693_v5, 0.0 }
 0x112   : > { %v1697_v8 = vpop.f32.mrf.mxu0 }
 0x113   : > { %v1698_v11 = vadd.f32 %v1697_v8, %v1696_v2  ;;  %v698_v12 = vadd.f32 %v697_v3, %v593_v6  ;;  %v746_v29 = vsel %vm740_vm0, %v719_v16, 0.0 }
 0x114   : > { %v1699_v13 = vpop.f32.mrf.mxu0  ;;  %v747_v37 = vadd.f32 %v746_v29, %v745_v31 }
 0x115   : > { %v598_v17 = vadd.f32 %v1698_v11, %v494_v9  ;;  %v720_v23 = vmax.f32 %v698_v12, 0.0 }
 0x116   : > { %v1700_v19 = vpop.f32.mrf.mxu0 }
 0x117   : > { %v703_v22 = vadd.f32 %v1810_v58, %v598_v17  ;;  %v1701_v24 = vadd.f32 %v1700_v19, %v1699_v13  ;;  %v748_v33 = vsel %vm740_vm0, %v720_v23, 0.0 }
 0x118   : > { %v1702_v26 = vpop.f32.mrf.mxu0  ;;  %v749_v41 = vadd.f32 %v748_v33, %v747_v37 }
 0x119   : > { %v721_v28 = vmax.f32 %v703_v22, 0.0  ;;  %v603_v30 = vadd.f32 %v1701_v24, %v499_v20 }
 0x11a   : > { %v1703_v32 = vpop.f32.mrf.mxu0 }
 0x11b   : > { %v1704_v34 = vadd.f32 %v1703_v32, %v1702_v26  ;;  %v708_v35 = vadd.f32 %v707_v27, %v603_v30  ;;  %v750_v40 = vsel %vm740_vm0, %v721_v28, 0.0  ;;  %v845_v26 = vpop.permute.xlu1 %844  ;;  %v898_v30 = vpop.permute.xlu0 %897 }
 0x11c   : > { %v751_v44 = vadd.f32 %v750_v40, %v749_v41 }
 0x11d   : > { %v608_v38 = vadd.f32 %v1704_v34, %v504_v36  ;;  %v722_v39 = vmax.f32 %v708_v35, 0.0 }
 0x11f   : > { %v713_v42 = vadd.f32 %v1813_v14, %v608_v38  ;;  %v752_v43 = vsel %vm740_vm0, %v722_v39, 0.0  ;;  %v840_v31 = vpop.permute.xlu1 %839  ;;  %v893_v35 = vpop.permute.xlu0 %892 }
 0x120   : > { %v753_v46 = vadd.f32 %v752_v43, %v751_v44 }
 0x121   : > { %v723_v45 = vmax.f32 %v713_v42, 0.0 }
 0x123   : > { %v754_v47 = vsel %vm740_vm0, %v723_v45, 0.0  ;;  %v835_v36 = vpop.permute.xlu1 %834  ;;  %v888_v37 = vpop.permute.xlu0 %887 }
 0x124   : > { %v755_v48 = vadd.f32 %v754_v47, %v753_v46 }
 0x126   : > { %v756_v49 = vrot.slane %v755_v48, 4 }
 0x127   : > { %v830_v38 = vpop.permute.xlu1 %829 }
 0x128   : > { %v757_v50 = vadd.f32 %v756_v49, %v755_v48 }
 0x12a   : > { %v758_v51 = vrot.slane %v757_v50, 2 }
 0x12b   : > { %v825_v40 = vpop.permute.xlu1 %824 }
 0x12c   : > { %v759_v52 = vadd.f32 %v758_v51, %v757_v50 }
 0x12e   : > { %v760_v53 = vrot.slane %v759_v52, 1 }
 0x12f   : > { %v820_v49 = vpop.permute.xlu1 %819 }
 0x130   : > { %v761_v54 = vadd.f32 %v760_v53, %v759_v52 }
 0x132   : > { %v763_v55 = vmul.f32 0.015625, %v761_v54 }
 0x134   : > { %v2335_v56 = vsub.f32 %v716_v7, %v763_v55  ;;  %v2337_v57 = vsub.f32 %v717_v4, %v763_v55  ;;  %v766_v58 = vsub.f32 %v718_v10, %v763_v55  ;;  %v767_v59 = vsub.f32 %v719_v16, %v763_v55 }
 0x135   : > { %v768_v60 = vsub.f32 %v720_v23, %v763_v55  ;;  %v769_v0 = vsub.f32 %v721_v28, %v763_v55  ;;  %v770_v6 = vsub.f32 %v722_v39, %v763_v55  ;;  %v771_v9 = vsub.f32 %v723_v45, %v763_v55  ;;  %v883_v39 = vpop.permute.xlu0 %882 }
 0x136   : > { %v772_v61 = vmul.f32 %v2335_v56, %v2335_v56  ;;  %v773_v62 = vmul.f32 %v2337_v57, %v2337_v57  ;;  %v774_v63 = vmul.f32 %v766_v58, %v766_v58  ;;  %v775_v1 = vmul.f32 %v767_v59, %v767_v59 }
 0x137   : > { %v776_v4 = vmul.f32 %v768_v60, %v768_v60  ;;  %v777_v10 = vmul.f32 %v769_v0, %v769_v0  ;;  %v778_v13 = vmul.f32 %v770_v6, %v770_v6  ;;  %v779_v16 = vmul.f32 %v771_v9, %v771_v9 }
 0x138   : > { %v780_v2 = vsel %vm740_vm0, %v772_v61, 0.0  ;;  %v781_v3 = vsel %vm740_vm0, %v773_v62, 0.0  ;;  %v783_v7 = vsel %vm740_vm0, %v774_v63, 0.0  ;;  %v785_v11 = vsel %vm740_vm0, %v775_v1, 0.0 }
 0x139   : > { %v782_v5 = vadd.f32 %v781_v3, %v780_v2  ;;  %v787_v14 = vsel %vm740_vm0, %v776_v4, 0.0  ;;  %v789_v17 = vsel %vm740_vm0, %v777_v10, 0.0  ;;  %v791_v19 = vsel %vm740_vm0, %v778_v13, 0.0  ;;  %v878_v48 = vpop.permute.xlu0 %877  ;;  %v815_v3 = vpop.permute.xlu1 %814 }
 0x13a   : > { %v793_v21 = vsel %vm740_vm0, %v779_v16, 0.0  ;;  %v1617_v16 = vld [vmem:[%s2538_s5 + $0x20] sm:$0xff] }
 0x13b   : > { %v784_v8 = vadd.f32 %v783_v7, %v782_v5  ;;  %1830 = vmatprep.mubr.msk.f32.mxu1 %vm999_vm3, %v1617_v16 }
 0x13d   : > { %v786_v12 = vadd.f32 %v785_v11, %v784_v8  ;;  %v873_v2 = vpop.permute.xlu0 %872  ;;  %v863_v7 = vpop.permute.xlu1 %862 }
 0x13f   : > { %v788_v15 = vadd.f32 %v787_v14, %v786_v12 }
 0x141   : > { %v790_v18 = vadd.f32 %v789_v17, %v788_v15  ;;  %v868_v4 = vpop.permute.xlu0 %867  ;;  %v958_v17 = vld [vmem:[%s2538_s5] sm:$0xff] }
 0x142   : > { %1852 = vmatprep.mubr.msk.f32.mxu0 %vm999_vm3, %v958_v17 }
 0x143   : > { %v792_v20 = vadd.f32 %v791_v19, %v790_v18 }
 0x145   : > { %v794_v22 = vadd.f32 %v793_v21, %v792_v20 }
 0x147   : > { %v795_v23 = vrot.slane %v794_v22, 4 }
 0x149   : > { %v796_v24 = vadd.f32 %v795_v23, %v794_v22 }
 0x14b   : > { %v797_v27 = vrot.slane %v796_v24, 2 }
 0x14d   : > { %v798_v28 = vadd.f32 %v797_v27, %v796_v24 }
 0x14f   : > { %v799_v29 = vrot.slane %v798_v28, 1 }
 0x151   : > { %v800_v32 = vadd.f32 %v799_v29, %v798_v28 }
 0x153   : > { %v801_v33 = vmul.f32 0.015625, %v800_v32 }
 0x155   : > { %v802_v34 = vadd.f32 1e-05, %v801_v33 }
 0x157   : > { %1939 = vrsqrt.f32 %v802_v34  ;;  %v959_v34 = vld [vmem:[%s2538_s5 + $0x8] sm:$0xff] }
 0x164   : > { %v1940_v41 = vpop.eup %1939 }
 0x165   : > { %v810_v42 = vmul.f32 %v1940_v41, %v770_v6  ;;  %v811_v43 = vmul.f32 %v1940_v41, %v771_v9  ;;  %v809_v44 = vmul.f32 %v1940_v41, %v769_v0  ;;  %v808_v45 = vmul.f32 %v1940_v41, %v768_v60 }
 0x166   : > { %v807_v50 = vmul.f32 %v1940_v41, %v767_v59  ;;  %v806_v51 = vmul.f32 %v1940_v41, %v766_v58  ;;  %v805_v61 = vmul.f32 %v1940_v41, %v2337_v57  ;;  %v804_v62 = vmul.f32 %v1940_v41, %v2335_v56  ;;  %v1359_v41 = vld [vmem:[%s2540_s7 + $0x18] sm:$0xff] }
 0x167   : > { %v859_v46 = vmul.f32 %v850_v25, %v811_v43  ;;  %v858_v47 = vmul.f32 %v845_v26, %v810_v42  ;;  %v857_v54 = vmul.f32 %v840_v31, %v809_v44  ;;  %v856_v55 = vmul.f32 %v835_v36, %v808_v45  ;;  %v961_v36 = vld [vmem:[%s2538_s5 + $0x18] sm:$0xff]  ;;  %v1358_v42 = vld [vmem:[%s2540_s7 + $0x10] sm:$0xff]  ;;  %v1357_v44 = vld [vmem:[%s2540_s7 + $0x8] sm:$0xff] }
 0x168   : > { %v855_v60 = vmul.f32 %v830_v38, %v807_v50  ;;  %v854_v1 = vmul.f32 %v825_v40, %v806_v51  ;;  %v853_v5 = vmul.f32 %v820_v49, %v805_v61  ;;  %v852_v6 = vmul.f32 %v815_v3, %v804_v62  ;;  %v1325_v38 = vld [vmem:[%s2539_s6 + $0x8] sm:$0xff]  ;;  %v1327_v40 = vld [vmem:[%s2539_s6 + $0x18] sm:$0xff]  ;;  %v1362_v45 = vld [vmem:[%s2541_s8 + $0x10] sm:$0xff] }
 0x169   : > { %v907_v52 = vadd.f32 %v898_v30, %v859_v46  ;;  %v906_v53 = vadd.f32 %v893_v35, %v858_v47  ;;  %v905_v63 = vadd.f32 %v888_v37, %v857_v54  ;;  %v904_v0 = vadd.f32 %v883_v39, %v856_v55  ;;  %v960_v35 = vld [vmem:[%s2538_s5 + $0x10] sm:$0xff]  ;;  %v1324_v37 = vld [vmem:[%s2539_s6] sm:$0xff]  ;;  %v1363_v43 = vld [vmem:[%s2541_s8 + $0x18] sm:$0xff] }
 0x16a   : > { %v903_v58 = vadd.f32 %v878_v48, %v855_v60  ;;  %v902_v59 = vadd.f32 %v873_v2, %v854_v1  ;;  %v901_v8 = vadd.f32 %v868_v4, %v853_v5  ;;  %v900_v57 = vadd.f32 %v863_v7, %v852_v6  ;;  %v1326_v39 = vld [vmem:[%s2539_s6 + $0x10] sm:$0xff]  ;;  %v1356_v46 = vld [vmem:[%s2540_s7] sm:$0xff]  ;;  %v1361_v47 = vld [vmem:[%s2541_s8 + $0x8] sm:$0xff] }
 0x16b   : > { %930 = vrot.lane.b32.xlu0 %v907_v52, %s2008_s13  ;;  %928 = vrot.lane.b32.xlu1 %v906_v53, %s2008_s13  ;;  %v1360_v48 = vld [vmem:[%s2541_s8] sm:$0xff]  ;;  %v1620_v2 = vld [vmem:[%s2538_s5 + $0x38] sm:$0xff] }
 0x16c   : > { %v1456_v49 = vld [vmem:[#allocation2] sm:$0x1] }
 0x16d   : > { %v1637_v3 = vld [vmem:[%s2538_s5 + $0x40] sm:$0xff] }
 0x16f   : > { %926 = vrot.lane.b32.xlu0 %v905_v63, %s2008_s13  ;;  %924 = vrot.lane.b32.xlu1 %v904_v0, %s2008_s13  ;;  %v1618_v63 = vld [vmem:[%s2538_s5 + $0x28] sm:$0xff]  ;;  %v1619_v0 = vld [vmem:[%s2538_s5 + $0x30] sm:$0xff] }
 0x173   : > { %922 = vrot.lane.b32.xlu0 %v903_v58, %s2008_s13  ;;  %920 = vrot.lane.b32.xlu1 %v902_v59, %s2008_s13 }
 0x177   : > { %918 = vrot.lane.b32.xlu0 %v901_v8, %s2008_s13  ;;  %916 = vrot.lane.b32.xlu1 %v900_v57, %s2008_s13  ;;  %v1638_v8 = vld [vmem:[%s2538_s5 + $0x48] sm:$0xff]  ;;  %v1639_v57 = vld [vmem:[%s2538_s5 + $0x50] sm:$0xff]  ;;  %s380_s13 = scalar_lea.vmem [#allocation3], %s379_s30 }
 0x178   : > { %s1557_s15 = sshll.u32 %s380_s13, 4  ;;  %s1558_s15 = int_to_ptr.vmem [resolvable:$true] %s1557_s15 }
 0x179   : > { %s1945_s23 = scalar_lea.vmem %s1558_s15, 16  ;;  %p1952_p0 = scmp.lt.s32.totalorder %s1558_s15, %s1950_s26 }
 0x17a   : > { %p1946_p11 = scmp.ne.s32.totalorder %s1558_s15, %s1945_s23 }
 0x17c   : > { %p1947_p12 = pnand %p1946_p11, %p2115_p5 }
 0x17e   : > { %p1948_p13 = pneg %p1947_p12 }
 0x1dd   : > { %v931_v56 = vpop.permute.xlu0 %930  ;;  %v929_v9 = vpop.permute.xlu1 %928 }
 0x1de   : > { %v948_v10 = vsel %vm940_vm1, 0.0, %v931_v56  ;;  %v947_v11 = vsel %vm940_vm1, 0.0, %v929_v9  ;;  %v1640_v56 = vld [vmem:[%s2538_s5 + $0x58] sm:$0xff]  ;;  %v2011_v9 = vmov 0.0  }
 0x1df   : > { %1836 = vmatprep.subr.msk.mxu0 %vm949_vm2, %v948_v10  ;;  %v957_v12 = vsel %vm949_vm2, %v948_v10, 0.0  ;;  %v956_v13 = vsel %vm949_vm2, %v947_v11, 0.0 }
 0x1e0   : > { %1837 = vmatpush3.msk.msra.mxu0 %vm949_vm2, %v948_v10  ;;  %989 = vrot.lane.b32.xlu0 %v957_v12, %s2009_s14 }
 0x1e1   : > { %987 = vrot.lane.b32.xlu1 %v956_v13, %s2009_s14  ;;  %1838 = vmatprep.subr.msk.mxu0 %vm949_vm2, %v947_v11  ;;  %v927_v14 = vpop.permute.xlu0 %926  ;;  %v925_v15 = vpop.permute.xlu1 %924 }
 0x1e2   : > { %v946_v18 = vsel %vm940_vm1, 0.0, %v927_v14  ;;  %v945_v19 = vsel %vm940_vm1, 0.0, %v925_v15  ;;  %1839 = vmatpush3.msk.msra.mxu0 %vm949_vm2, %v947_v11 }
 0x1e3   : > { %1840 = vmatprep.subr.msk.mxu0 %vm949_vm2, %v946_v18  ;;  %v955_v20 = vsel %vm949_vm2, %v946_v18, 0.0  ;;  %v954_v21 = vsel %vm949_vm2, %v945_v19, 0.0 }
 0x1e4   : > { %1841 = vmatpush3.msk.msra.mxu0 %vm949_vm2, %v946_v18  ;;  %985 = vrot.lane.b32.xlu0 %v955_v20, %s2009_s14 }
 0x1e5   : > { %983 = vrot.lane.b32.xlu1 %v954_v21, %s2009_s14  ;;  %1842 = vmatprep.subr.msk.mxu0 %vm949_vm2, %v945_v19  ;;  %v923_v22 = vpop.permute.xlu0 %922  ;;  %v921_v23 = vpop.permute.xlu1 %920 }
 0x1e6   : > { %v944_v24 = vsel %vm940_vm1, 0.0, %v923_v22  ;;  %v943_v25 = vsel %vm940_vm1, 0.0, %v921_v23  ;;  %1843 = vmatpush3.msk.msra.mxu0 %vm949_vm2, %v945_v19 }
 0x1e7   : > { %1844 = vmatprep.subr.msk.mxu0 %vm949_vm2, %v944_v24  ;;  %v953_v26 = vsel %vm949_vm2, %v944_v24, 0.0  ;;  %v952_v27 = vsel %vm949_vm2, %v943_v25, 0.0 }
 0x1e8   : > { %1845 = vmatpush3.msk.msra.mxu0 %vm949_vm2, %v944_v24  ;;  %981 = vrot.lane.b32.xlu0 %v953_v26, %s2009_s14 }
 0x1e9   : > { %979 = vrot.lane.b32.xlu1 %v952_v27, %s2009_s14  ;;  %1846 = vmatprep.subr.msk.mxu0 %vm949_vm2, %v943_v25  ;;  %v919_v28 = vpop.permute.xlu0 %918  ;;  %v917_v29 = vpop.permute.xlu1 %916 }
 0x1ea   : > { %v942_v30 = vsel %vm940_vm1, 0.0, %v919_v28  ;;  %v941_v31 = vsel %vm940_vm1, 0.0, %v917_v29  ;;  %1847 = vmatpush3.msk.msra.mxu0 %vm949_vm2, %v943_v25 }
 0x1eb   : > { %1848 = vmatprep.subr.msk.mxu0 %vm949_vm2, %v942_v30  ;;  %v951_v32 = vsel %vm949_vm2, %v942_v30, 0.0  ;;  %v950_v33 = vsel %vm949_vm2, %v941_v31, 0.0 }
 0x1ec   : > { %1849 = vmatpush3.msk.msra.mxu0 %vm949_vm2, %v942_v30  ;;  %977 = vrot.lane.b32.xlu0 %v951_v32, %s2009_s14 }
 0x1ed   : > { %975 = vrot.lane.b32.xlu1 %v950_v33, %s2009_s14  ;;  %1850 = vmatprep.subr.msk.mxu0 %vm949_vm2, %v941_v31 }
 0x1ee   : > { %1851 = vmatpush3.msk.msra.mxu0 %vm949_vm2, %v941_v31 }
 0x1ef   : > { %1853 = vmatmul.mubr.msk.f32.vlgmr.msra.gmra.mxu0 %vm999_vm3, %v959_v34  ;;  %1880 = vmatprep.subr.mxu0 %v2011_v9 }
 0x1f0   : > { %1213 = vrot.lane.b32.xlu0 %v957_v12, %s2010_s12  ;;  %1855 = vmatprep.mubr.msk.f32.mxu0 %vm999_vm3, %v960_v35 }
 0x1f1   : > { %1211 = vrot.lane.b32.xlu1 %v956_v13, %s2010_s12 }
 0x1f3   : > { %1856 = vmatmul.mubr.msk.f32.gmra.mxu0 %vm999_vm3, %v961_v36 }
 0x1f4   : > { %1209 = vrot.lane.b32.xlu0 %v955_v20, %s2010_s12  ;;  %1888 = vmatprep.mubr.msk.f32.mxu0 %vm2012_vm4, %v2011_v9 }
 0x1f5   : > { %1207 = vrot.lane.b32.xlu1 %v954_v21, %s2010_s12 }
 0x1f8   : > { %1205 = vrot.lane.b32.xlu0 %v953_v26, %s2010_s12 }
 0x1f9   : > { %1203 = vrot.lane.b32.xlu1 %v952_v27, %s2010_s12 }
 0x1fc   : > { %1201 = vrot.lane.b32.xlu0 %v951_v32, %s2010_s12 }
 0x1fd   : > { %1199 = vrot.lane.b32.xlu1 %v950_v33, %s2010_s12  ;;  %s1646_s12 = sshll.u32 %s2098_s10, 4  ;;  %s1951_s10 = scalar_lea.vmem %s1950_s26, 32 }
 0x1fe   : > { %s2498_s17 = scalar_lea.hbm %s2544_s11, %s1646_s12  ;;  %p1953_p1 = scmp.lt.s32.totalorder %s1951_s10, %s1945_s23 }
 0x200   : > { %1330 = vperm.xlu0 %1937, %v1324_v37   ;;  %p1954_p2 = por %p1953_p1, %p1952_p0 }
 0x201   : > { %1335 = vperm.xlu1 %1938, %v1325_v38  }
 0x202   : > { %p1955_p3 = pnand %p1954_p2, %p1948_p13 }
 0x204   : > { %1340 = vperm.xlu0 %1937, %v1326_v39  }
 0x205   : > { %1345 = vperm.xlu1 %1938, %v1327_v40  }
 0x208   : > { %1424 = vperm.xlu0 %1937, %v1359_v41  }
 0x209   : > { %1419 = vperm.xlu1 %1938, %v1358_v42  }
 0x20c   : > { %1448 = vperm.xlu0 %1937, %v1363_v43  }
 0x20d   : > { %1414 = vperm.xlu1 %1938, %v1357_v44  }
 0x210   : > { %1443 = vperm.xlu0 %1937, %v1362_v45  }
 0x211   : > { %1409 = vperm.xlu1 %1938, %v1356_v46  }
 0x214   : > { %1438 = vperm.xlu0 %1937, %v1361_v47  }
 0x215   : > { %1433 = vperm.xlu1 %1938, %v1360_v48  }
 0x218   : > { %1459 = vperm.xlu0 %1937, %v1456_v49  }
 0x252   : > { %v990_v50 = vpop.permute.xlu0 %989 }
 0x253   : > { %v988_v51 = vpop.permute.xlu1 %987  ;;  %1814 = vmatprep.subr.mxu1 %v990_v50 }
 0x254   : > { %1815 = vmatpush3.msra.mxu1 %v990_v50 }
 0x255   : > { %1816 = vmatprep.subr.mxu1 %v988_v51 }
 0x256   : > { %v986_v52 = vpop.permute.xlu0 %985  ;;  %1817 = vmatpush3.msra.mxu1 %v988_v51 }
 0x257   : > { %v984_v53 = vpop.permute.xlu1 %983  ;;  %1818 = vmatprep.subr.mxu1 %v986_v52 }
 0x258   : > { %1819 = vmatpush3.msra.mxu1 %v986_v52 }
 0x259   : > { %1820 = vmatprep.subr.mxu1 %v984_v53 }
 0x25a   : > { %v982_v54 = vpop.permute.xlu0 %981  ;;  %1821 = vmatpush3.msra.mxu1 %v984_v53 }
 0x25b   : > { %v980_v55 = vpop.permute.xlu1 %979  ;;  %1822 = vmatprep.subr.mxu1 %v982_v54 }
 0x25c   : > { %1823 = vmatpush3.msra.mxu1 %v982_v54 }
 0x25d   : > { %1824 = vmatprep.subr.mxu1 %v980_v55 }
 0x25e   : > { %v978_v61 = vpop.permute.xlu0 %977  ;;  %1825 = vmatpush3.msra.mxu1 %v980_v55 }
 0x25f   : > { %v976_v62 = vpop.permute.xlu1 %975  ;;  %1826 = vmatprep.subr.mxu1 %v978_v61 }
 0x260   : > { %1827 = vmatpush3.msra.mxu1 %v978_v61 }
 0x261   : > { %1828 = vmatprep.subr.mxu1 %v976_v62 }
 0x262   : > { %v1214_v60 = vpop.permute.xlu0 %1213  ;;  %1829 = vmatpush3.msra.mxu1 %v976_v62 }
 0x263   : > { %v1212_v1 = vpop.permute.xlu1 %1211  ;;  %1831 = vmatmul.mubr.msk.f32.vlgmr.msra.gmra.mxu1 %vm999_vm3, %v1618_v63  ;;  %1858 = vmatprep.subr.mxu1 %v1214_v60 }
 0x264   : > { %1859 = vmatpush3.msra.mxu1 %v1214_v60  ;;  %1833 = vmatprep.mubr.msk.f32.mxu1 %vm999_vm3, %v1619_v0 }
 0x265   : > { %1860 = vmatprep.subr.mxu1 %v1212_v1 }
 0x266   : > { %v1210_v58 = vpop.permute.xlu0 %1209  ;;  %1861 = vmatpush3.msra.mxu1 %v1212_v1 }
 0x267   : > { %v1208_v59 = vpop.permute.xlu1 %1207  ;;  %1862 = vmatprep.subr.mxu1 %v1210_v58  ;;  %1834 = vmatmul.mubr.msk.f32.gmra.mxu1 %vm999_vm3, %v1620_v2 }
 0x268   : > { %1863 = vmatpush3.msra.mxu1 %v1210_v58  ;;  %1874 = vmatprep.mubr.msk.f32.mxu1 %vm999_vm3, %v1637_v3 }
 0x269   : > { %1864 = vmatprep.subr.mxu1 %v1208_v59 }
 0x26a   : > { %v1206_v5 = vpop.permute.xlu0 %1205  ;;  %1865 = vmatpush3.msra.mxu1 %v1208_v59 }
 0x26b   : > { %v1204_v6 = vpop.permute.xlu1 %1203  ;;  %1866 = vmatprep.subr.mxu1 %v1206_v5 }
 0x26c   : > { %1867 = vmatpush3.msra.mxu1 %v1206_v5 }
 0x26d   : > { %1868 = vmatprep.subr.mxu1 %v1204_v6 }
 0x26e   : > { %v1202_v4 = vpop.permute.xlu0 %1201  ;;  %1869 = vmatpush3.msra.mxu1 %v1204_v6 }
 0x26f   : > { %1870 = vmatprep.subr.mxu1 %v1202_v4  ;;  %v1200_v7 = vpop.permute.xlu1 %1199 }
 0x270   : > { %1871 = vmatpush3.msra.mxu1 %v1202_v4 }
 0x271   : > { %1872 = vmatprep.subr.mxu1 %v1200_v7 }
 0x272   : > { %1873 = vmatpush3.msra.mxu1 %v1200_v7 }
 0x273   : > { %1875 = vmatmul.mubr.msk.f32.vlgmr.msra.gmra.mxu1 %vm999_vm3, %v1638_v8 }
 0x274   : > { %1877 = vmatprep.mubr.msk.f32.mxu1 %vm999_vm3, %v1639_v57 }
 0x277   : > { %1878 = vmatmul.mubr.msk.f32.gmra.mxu1 %vm999_vm3, %v1640_v56 }
 0x27b   : > { %v1331_v20 = vpop.permute.xlu0 %1330 }
 0x27c   : > { %v1336_v18 = vpop.permute.xlu1 %1335 }
 0x27f   : > { %v1341_v38 = vpop.permute.xlu0 %1340 }
 0x280   : > { %v1346_v32 = vpop.permute.xlu1 %1345 }
 0x2af   : > { %v1854_v11 = vpop.f32.mrf.mxu0 }
 0x2b1   : > { %v1175_v14 = vpop.f32.mrf.mxu0 }
 0x2b3   : > { %v1857_v15 = vpop.f32.mrf.mxu0 }
 0x2b5   : > { %v1185_v23 = vpop.f32.mrf.mxu0 }
 0x323   : > { %v1832_v10 = vpop.f32.mrf.mxu1 }
 0x324   : > { %v1181_v17 = vadd.f32 %v1854_v11, %v1832_v10 }
 0x325   : > { %v1078_v12 = vpop.f32.mrf.mxu1 }
 0x326   : > { %v1176_v21 = vadd.f32 %v1175_v14, %v1078_v12 }
 0x327   : > { %v1835_v13 = vpop.f32.mrf.mxu1 }
 0x328   : > { %v1191_v25 = vadd.f32 %v1857_v15, %v1835_v13 }
 0x329   : > { %v1088_v16 = vpop.f32.mrf.mxu1 }
 0x32a   : > { %v1186_v29 = vadd.f32 %v1185_v23, %v1088_v16  ;;  %v1425_v16 = vpop.permute.xlu0 %1424 }
 0x333   : > { %v1876_v19 = vpop.f32.mrf.mxu1 }
 0x334   : > { %v1321_v22 = vadd.f32 %v1876_v19, %v1181_v17  ;;  %v1420_v17 = vpop.permute.xlu1 %1419 }
 0x335   : > { %v1301_v24 = vpop.f32.mrf.mxu1 }
 0x336   : > { %v1349_v26 = vadd.f32 %v1336_v18, %v1321_v22  ;;  %v1320_v27 = vadd.f32 %v1301_v24, %v1176_v21  ;;  %v1449_v18 = vpop.permute.xlu0 %1448 }
 0x337   : > { %v1879_v28 = vpop.f32.mrf.mxu1 }
 0x338   : > { %v1348_v30 = vadd.f32 %v1331_v20, %v1320_v27  ;;  %v1323_v31 = vadd.f32 %v1879_v28, %v1191_v25  ;;  %v1353_v34 = vmax.f32 %v1349_v26, 0.0  ;;  %v1415_v19 = vpop.permute.xlu1 %1414 }
 0x339   : > { %v1311_v33 = vpop.f32.mrf.mxu1 }
 0x33a   : > { %v1352_v35 = vmax.f32 %v1348_v30, 0.0  ;;  %v1351_v36 = vadd.f32 %v1346_v32, %v1323_v31  ;;  %v1322_v37 = vadd.f32 %v1311_v33, %v1186_v29  ;;  %v1365_v41 = vsel %vm740_vm0, %v1353_v34, 0.0  ;;  %v1444_v24 = vpop.permute.xlu0 %1443 }
 0x33c   : > { %v1364_v39 = vsel %vm740_vm0, %v1352_v35, 0.0  ;;  %v1350_v40 = vadd.f32 %v1341_v38, %v1322_v37  ;;  %v1355_v42 = vmax.f32 %v1351_v36, 0.0  ;;  %v1410_v28 = vpop.permute.xlu1 %1409  ;;  %v1455_v37 = vld [vmem:[%s2542_s9] sm:$0x1]  ;;  %v1462_v38 = vlaneseq }
 0x33d   : > { %v1366_v44 = vadd.f32 %v1365_v41, %v1364_v39 }
 0x33e   : > { %v1354_v43 = vmax.f32 %v1350_v40, 0.0  ;;  %v1369_v47 = vsel %vm740_vm0, %v1355_v42, 0.0  ;;  %v1439_v33 = vpop.permute.xlu0 %1438  ;;  %v1463_v39 = vshrl.u32 %v1462_v38, 7 }
 0x340   : > { %v1367_v45 = vsel %vm740_vm0, %v1354_v43, 0.0  ;;  %v1464_v40 = vsub.s32 0, %v1463_v39 }
 0x341   : > { %v1368_v46 = vadd.f32 %v1367_v45, %v1366_v44 }
 0x342   : > { %v1460_v41 = vpop.permute.xlu0 %1459 }
 0x343   : > { %v1370_v48 = vadd.f32 %v1369_v47, %v1368_v46 }
 0x345   : > { %v1371_v49 = vrot.slane %v1370_v48, 4 }
 0x347   : > { %v1372_v50 = vadd.f32 %v1371_v49, %v1370_v48 }
 0x349   : > { %v1373_v51 = vrot.slane %v1372_v50, 2 }
 0x34b   : > { %v1374_v52 = vadd.f32 %v1373_v51, %v1372_v50 }
 0x34d   : > { %v1375_v53 = vrot.slane %v1374_v52, 1 }
 0x34f   : > { %v1376_v54 = vadd.f32 %v1375_v53, %v1374_v52 }
 0x351   : > { %v1378_v55 = vmul.f32 0.03125, %v1376_v54 }
 0x353   : > { %v1379_v61 = vsub.f32 %v1352_v35, %v1378_v55  ;;  %v1380_v62 = vsub.f32 %v1353_v34, %v1378_v55  ;;  %v1381_v63 = vsub.f32 %v1354_v43, %v1378_v55  ;;  %v1382_v0 = vsub.f32 %v1355_v42, %v1378_v55  ;;  %v1434_v35 = vpop.permute.xlu1 %1433 }
 0x354   : > { %v1465_v42 = vrot.slane %v1460_v41, %v1464_v40 }
 0x355   : > { %v1383_v60 = vmul.f32 %v1379_v61, %v1379_v61  ;;  %v1384_v1 = vmul.f32 %v1380_v62, %v1380_v62  ;;  %v1385_v2 = vmul.f32 %v1381_v63, %v1381_v63  ;;  %v1386_v3 = vmul.f32 %v1382_v0, %v1382_v0 }
 0x357   : > { %v1387_v58 = vsel %vm740_vm0, %v1383_v60, 0.0  ;;  %v1388_v59 = vsel %vm740_vm0, %v1384_v1, 0.0  ;;  %v1390_v6 = vsel %vm740_vm0, %v1385_v2, 0.0  ;;  %v1392_v7 = vsel %vm740_vm0, %v1386_v3, 0.0 }
 0x358   : > { %v1389_v5 = vadd.f32 %v1388_v59, %v1387_v58 }
 0x35a   : > { %v1391_v4 = vadd.f32 %v1390_v6, %v1389_v5 }
 0x35c   : > { %v1393_v8 = vadd.f32 %v1392_v7, %v1391_v4 }
 0x35e   : > { %v1394_v57 = vrot.slane %v1393_v8, 4 }
 0x360   : > { %v1395_v56 = vadd.f32 %v1394_v57, %v1393_v8 }
 0x362   : > { %v1396_v10 = vrot.slane %v1395_v56, 2 }
 0x364   : > { %v1397_v11 = vadd.f32 %v1396_v10, %v1395_v56 }
 0x366   : > { %v1398_v12 = vrot.slane %v1397_v11, 1 }
 0x368   : > { %v1399_v13 = vadd.f32 %v1398_v12, %v1397_v11 }
 0x36a   : > { %v1400_v14 = vmul.f32 0.03125, %v1399_v13 }
 0x36c   : > { %v1401_v15 = vadd.f32 1e-05, %v1400_v14 }
 0x36e   : > { %1941 = vrsqrt.f32 %v1401_v15 }
 0x37b   : > { %v1942_v20 = vpop.eup %1941 }
 0x37c   : > { %v1405_v21 = vmul.f32 %v1942_v20, %v1381_v63  ;;  %v1406_v22 = vmul.f32 %v1942_v20, %v1382_v0  ;;  %v1404_v23 = vmul.f32 %v1942_v20, %v1380_v62  ;;  %v1403_v27 = vmul.f32 %v1942_v20, %v1379_v61 }
 0x37e   : > { %v1429_v25 = vmul.f32 %v1420_v17, %v1405_v21  ;;  %v1430_v26 = vmul.f32 %v1425_v16, %v1406_v22  ;;  %v1428_v30 = vmul.f32 %v1415_v19, %v1404_v23  ;;  %v1427_v32 = vmul.f32 %v1410_v28, %v1403_v27 }
 0x380   : > { %v1454_v29 = vadd.f32 %v1449_v18, %v1430_v26  ;;  %v1453_v31 = vadd.f32 %v1444_v24, %v1429_v25  ;;  %v1452_v34 = vadd.f32 %v1439_v33, %v1428_v30  ;;  %v1451_v36 = vadd.f32 %v1434_v35, %v1427_v32 }
 0x382   : > { %1881 = vmatpush3.msra.mxu0 %v1454_v29 }
 0x383   : > { %1882 = vmatprep.subr.mxu0 %v2011_v9 }
 0x384   : > { %1883 = vmatpush3.msra.mxu0 %v1453_v31 }
 0x385   : > { %1884 = vmatprep.subr.mxu0 %v2011_v9 }
 0x386   : > { %1885 = vmatpush3.msra.mxu0 %v1452_v34 }
 0x387   : > { %1886 = vmatprep.subr.mxu0 %v2011_v9 }
 0x388   : > { %1887 = vmatpush3.msra.mxu0 %v1451_v36 }
 0x389   : > { %1889 = vmatmul.mubr.msk.f32.vlgmr.msra.gmra.mxu0 %vm1466_vm5, %v1455_v37 }
 0x449   : > { %v1536_v43 = vpop.f32.mrf.mxu0 }
 0x44a   : > { %v1537_v44 = vadd.f32 %v1536_v43, %v1465_v42 }
 0x44b   : > { %v1890_v45 = vpop.f32.mrf.mxu0 }
 0x44c   : > { %v1540_v46 = vmul.f32 1.442695, %v1537_v44 }
 0x44e   : > { %1943 = vpow2.f32 %v1540_v46 }
 0x45b   : > { %v1944_v9 = vpop.eup %1943 }
 0x45c   : > { %1543 = vst.msk [vmem:[%s380_s13] sm:$0x1] %vm1542_vm6, %v1944_v9 }
 0x45d   : > { %1958 = shalt.err (!%p1955_p3)
}
 0x45e   : > { %s1959_s12 = scalar_lea.hbm %s2498_s17, 16  ;;  %s1963_s14 = scalar_lea.hbm %s2544_s11, 32 }
 0x45f   : > { %p1960_p4 = scmp.ne.s32.totalorder %s2498_s17, %s1959_s12  ;;  %p1964_p9 = scmp.lt.s32.totalorder %s2498_s17, %s2544_s11 }
 0x460   : > { %p1965_p10 = scmp.lt.s32.totalorder %s1963_s14, %s1959_s12 }
 0x461   : > { %p1961_p7 = pnand %p1960_p4, %p2115_p5 }
 0x462   : > { %p1966_p11 = por %p1965_p10, %p1964_p9 }
 0x463   : > { %p1962_p8 = pneg %p1961_p7 }
 0x465   : > { %p1967_p12 = pnand %p1966_p11, %p1962_p8 }
 0x467   : > { %1970 = shalt.err (!%p1967_p12)
}
 0x468   : > { %1892 = dma.vmem_to_hbm [thread:$0]  (%p2115_p5), %s1558_s15, 16, %s2498_s17, %s1545_s18  }
 0x469 PF: > { %p1898_p13 = scmp.ge.s32.totalorder %s2005_s22, 2  ;;  %s1569_s23 = sand.u32 1, %s1993_s19  }
 0x46a   : > { %s1570_s26 = scalar_lea.sflag [#allocation4], %s1569_s23 }
 0x46b   : > { %p1895_p0 = pnand %p1898_p13, %p2119_p6 }
 0x46d   : > { %p1896_p1 = pneg %p1895_p0 }
 0x46f   : > { %1988 = dma.done.wait (%p1896_p1), %s1570_s26, 16  }
 0x470   : > { %1990 = vsyncadd (%p1896_p1), %s1570_s26, 4294967280  ;;  %p23_p2 = scmp.ge.s32.totalorder %s2102_s24, 4   ;;  %s2547_s19 = smov %s1997_s20 }
 0x471   : > { %s2548_s20 = smov %s2001_s21  ;;  %s2549_s21 = smov %s2113_s27 }
 0x472   : > { %s2550_s22 = smov %s2102_s24  ;;  %25 = sbr.rel (!%p23_p2) target bundleno = 6 (0x6), region = 101 }
 0x477   :  { %1574 = vsyncpa [#allocation4], 1 }
 0x478   :  { %1576 = vsyncpa [#allocation4 + $0x1], 1 }

</bundles_post_ra>
